<compile_context>
chip_gen: v7x
topology: tpu7x:2x2x1
jax: 0.10.0
libtpu: 0.0.40
codegen_flags: <defaults>
</compile_context>

<pallas_src>
import functools

import jax
import jax.numpy as jnp
from jax.experimental import pallas as pl
from jax.experimental.pallas import tpu as pltpu


def _round_up(x, m):
    return (x + m - 1) // m * m


def _swish(x):
    return x * jax.nn.sigmoid(x)


# ----------------------------- Pallas kernel --------------------------------

def point_conv_kernel(x_ref, qmask_ref,
                      w1_ref, b1_ref, w2_ref, b2_ref, w3_ref, b3_ref,
                      wl_ref, bl_ref, out_ref, *, nbhd, dcoords, cin):
    tmnb = x_ref.shape[0]              # tile_m * nbhd
    tm = tmnb // nbhd
    J = w3_ref.shape[1]                # cin * mid (layer-3 pre-tiled along lanes)
    mid = J // cin
    wdt = w2_ref.dtype                 # f32 or bf16 (matmul-operand dtype)

    x = x_ref[...]                     # (tm*nbhd, D+cin): [deltas | masked values]

    # ---- WeightNet, all on the MXU.  w1 has zero rows for the value lanes,
    # so the merged stream can be fed directly (no lane slicing).
    h = _swish(jnp.dot(x, w1_ref[...], preferred_element_type=jnp.float32)
               + b1_ref[...])
    h = _swish(jnp.dot(h.astype(wdt), w2_ref[...],
                       preferred_element_type=jnp.float32) + b2_ref[...])
    # layer-3 weights/bias are tiled cin times along lanes in the wrapper, so
    # w is already the lane-packed [c*mid + m] layout of the WeightNet output.
    w = _swish(jnp.dot(h.astype(wdt), w3_ref[...],
                       preferred_element_type=jnp.float32) + b3_ref[...])   # (tm*nbhd, J)

    # ---- lane-expand the (mask-folded) values into the same [c*mid+m] layout
    # (exact: lane broadcast + concat, no matmul rounding).
    xf = x.astype(jnp.float32)
    v_rep = jnp.concatenate(
        [jnp.broadcast_to(xf[:, dcoords + c: dcoords + c + 1], (tmnb, mid))
         for c in range(cin)], axis=-1)                                      # (tm*nbhd, J)

    # ---- lane-packed neighborhood contraction: one VPU multiply + one
    # sublane reduction over nbhd.  The reshape only splits the sublane-major
    # axis (nbhd is padded to a multiple of 8 in the wrapper).
    packed = (v_rep * w).reshape(tm, nbhd, J)
    partial = jnp.sum(packed, axis=1)                                        # (tm, J)

    # ---- final linear + query mask; output stored unpadded at (tm, cout).
    out = jnp.dot(partial, wl_ref[...],
                  preferred_element_type=jnp.float32) + bl_ref[...]
    out_ref[...] = jnp.where(qmask_ref[...] > 0, out, 0.0)


# --------------------------- sizing heuristics -------------------------------

def _vmem_capacity_bytes():
    try:
        cap = getattr(pltpu.get_tpu_info(), "vmem_capacity_bytes", None)
        if cap:
            return int(cap)
    except Exception:
        pass
    return 128 * 1024 * 1024


def _vmem_limit_bytes():
    # v7x: 64 MiB physical -> 32 MiB scoped; v5e/v6e: 128 MiB -> 64 MiB scoped.
    return int(min(_vmem_capacity_bytes() // 2, 64 * 1024 * 1024))


def _choose_tile_m(R, nb):
    cap = _vmem_capacity_bytes()
    budget = min(cap // 4, 24 * 1024 * 1024)       # ~16 MiB on v7x, 24 MiB else
    # Per query row (f32, last dim lane-pads to 128 in VMEM):
    #   merged input stream x2 (double buffer) + ~5 in-kernel intermediates
    #   (h1, h2, w_tiled, v_rep, packed) + qmask/out/partial slack.
    per_row = (2 + 5) * nb * 128 * 4 + 4 * 128 * 4
    tile_m = budget // per_row
    tile_m = max(8, min(1024, (tile_m // 8) * 8))
    # Keep >= 4 grid steps so the "parallel" axis shards across TCs (v7x
    # megacore) and DMA overlaps compute even for moderate R.
    tile_m = min(tile_m, max(8, _round_up(-(-R // 4), 8)))
    return int(tile_m)


# ------------------------------- wrapper -------------------------------------

def point_conv_pallas(deltas, values, nbhd_mask, query_mask, params, *,
                      tile_m=None, use_bf16=False):
    """deltas (R, nb, D), values (R, nb, Cin), nbhd_mask (R, nb), query_mask (R, 1)."""
    R, nb, D = deltas.shape
    cin = values.shape[-1]
    hidden = params["w1"].shape[1]
    mid = params["w3"].shape[1]
    cout = params["bl"].shape[-1]
    f32 = jnp.float32

    # Fold the neighbor mask into the values (mask is 0/1 and the contraction
    # is bilinear, so masking one operand == masking both). where() so that
    # non-finite padded values can never leak through 0 * NaN.
    mvalues = jnp.where(nbhd_mask[..., None] > 0, values.astype(f32), 0.0)
    deltas = deltas.astype(f32)

    # Pad the neighbor axis to a multiple of 8 (sublane group) with zero rows
    # so the in-kernel reshape / nbhd reduction stay aligned.
    nbp = _round_up(nb, 8)
    if nbp != nb:
        deltas = jnp.pad(deltas, ((0, 0), (0, nbp - nb), (0, 0)))
        mvalues = jnp.pad(mvalues, ((0, 0), (0, nbp - nb), (0, 0)))
        nb = nbp

    # Merge deltas and masked values into a single lane-packed input stream.
    merged = jnp.concatenate([deltas, mvalues], axis=-1).reshape(R * nb, D + cin)
    qmask = query_mask.reshape(R, 1).astype(f32)

    if tile_m is None:
        tile_m = _choose_tile_m(R, nb)
    Rp = _round_up(R, tile_m)
    if Rp != R:
        merged = jnp.pad(merged, ((0, (Rp - R) * nb), (0, 0)))
        qmask = jnp.pad(qmask, ((0, Rp - R), (0, 0)))

    # Parameter prep (wrapper-side, one-time):
    #   w1f: zero rows for the value lanes so the merged stream feeds layer 1.
    #   w3t/b3t: layer 3 tiled cin times along lanes -> output already in the
    #            [c*mid + m] layout needed by the contraction/final linear.
    w1f = jnp.concatenate([params["w1"].astype(f32),
                           jnp.zeros((cin, hidden), f32)], axis=0)     # (D+cin, hidden)
    b1 = params["b1"].astype(f32)
    w2 = params["w2"].astype(f32)
    b2 = params["b2"].astype(f32)
    w3t = jnp.tile(params["w3"].astype(f32), (1, cin))                 # (hidden, cin*mid)
    b3t = jnp.tile(params["b3"].astype(f32), (1, cin))                 # (1, cin*mid)
    wl = params["wl"].astype(f32)                                      # (cin*mid, cout)
    bl = params["bl"].astype(f32)                                      # (1, cout)

    # Optional bf16 streaming / MXU-operand path (v6e/v7x). Default f32 keeps
    # the 1e-4 match against the f32 reference.
    io_dtype = jnp.bfloat16 if use_bf16 else f32
    merged = merged.astype(io_dtype)
    w1f_k, w2_k, w3t_k = (w1f.astype(io_dtype), w2.astype(io_dtype),
                          w3t.astype(io_dtype))

    kernel = functools.partial(point_conv_kernel, nbhd=nb, dcoords=D, cin=cin)

    def full_spec(a):
        nd = a.ndim
        return pl.BlockSpec(a.shape, lambda i, _nd=nd: (0,) * _nd)

    out = pl.pallas_call(
        kernel,
        out_shape=jax.ShapeDtypeStruct((Rp, cout), jnp.float32),
        grid=(Rp // tile_m,),
        in_specs=[
            pl.BlockSpec((tile_m * nb, D + cin), lambda i: (i, 0)),
            pl.BlockSpec((tile_m, 1), lambda i: (i, 0)),
            full_spec(w1f_k), full_spec(b1),
            full_spec(w2_k), full_spec(b2),
            full_spec(w3t_k), full_spec(b3t),
            full_spec(wl), full_spec(bl),
        ],
        out_specs=pl.BlockSpec((tile_m, cout), lambda i: (i, 0)),
        compiler_params=pltpu.CompilerParams(
            dimension_semantics=("parallel",),
            vmem_limit_bytes=_vmem_limit_bytes()),
    )(merged, qmask, w1f_k, b1, w2_k, b2, w3t_k, b3t, wl, bl)

    return out[:R] if Rp != R else out


# ------------------------------ JAX glue -------------------------------------
# kNN neighbor selection + gather (data-dependent indexing) stays in plain JAX.

def knn_points(k, coords, query_coords, mask):
    # squared euclidean distances (B, M, N); masked points pushed far away
    d = jnp.sum((query_coords[:, :, None, :] - coords[:, None, :, :]) ** 2, -1)
    d = jnp.where(mask[:, None, :], d, jnp.full_like(d, 1e8))
    _, idx = jax.lax.top_k(-d, k)                                 # (B, M, k)
    return idx


def index_points(points, idx):
    return jax.vmap(lambda p, i: p[i])(points, idx)


def point_conv_forward(coords, values, mask, params, *, num_nbhd,
                       use_bf16=False):
    """PointConv.forward with sampling_fraction=1 (identity subsample)."""
    # TODO(synk): farthest-point subsampling for sampling_fraction < 1 not implemented.
    B, N, D = coords.shape
    cin = values.shape[-1]
    query_coords, query_mask = coords, mask                       # M == N

    k = min(num_nbhd, N)
    idx = knn_points(k, coords, query_coords, mask)
    nbhd_coords = index_points(coords, idx)                       # (B, M, k, D)
    nbhd_values = index_points(values, idx)                       # (B, M, k, Cin)
    nbhd_mask = index_points(mask, idx)                           # (B, M, k)
    deltas = query_coords[:, :, None, :] - nbhd_coords            # (B, M, k, D)

    R = B * N
    out = point_conv_pallas(
        deltas.reshape(R, k, D).astype(jnp.float32),
        nbhd_values.reshape(R, k, cin).astype(jnp.float32),
        nbhd_mask.reshape(R, k).astype(jnp.float32),
        query_mask.reshape(R, 1).astype(jnp.float32),
        params, use_bf16=use_bf16)
    cout = params["bl"].shape[-1]
    return query_coords, out.reshape(B, N, cout), query_mask


# --------------------------- pure-JAX reference -------------------------------

def reference_forward(coords, values, mask, params, *, num_nbhd):
    k = min(num_nbhd, coords.shape[1])
    idx = knn_points(k, coords, coords, mask)
    nc, nv, nm = (index_points(coords, idx), index_points(values, idx),
                  index_points(mask, idx))
    deltas = coords[:, :, None, :] - nc
    sw = lambda x: x * jax.nn.sigmoid(x)
    h = sw(deltas @ params["w1"] + params["b1"][0])
    h = sw(h @ params["w2"] + params["b2"][0])
    w = sw(h @ params["w3"] + params["b3"][0])
    mw = jnp.where(nm[..., None], w, 0.0)
    mv = jnp.where(nm[..., None], nv, 0.0)
    partial = jnp.einsum("bmnc,bmnk->bmck", mv, mw)
    B, M = partial.shape[:2]
    out = partial.reshape(B, M, -1) @ params["wl"] + params["bl"][0]
    return coords, jnp.where(mask[..., None], out, 0.0), mask


# --------------------------------- main ---------------------------------------

if __name__ == "__main__":
    B, N, D = 2, 16, 3
    Cin, Cout, mid, hidden, num_nbhd = 4, 8, 16, 32, 8

    key = jax.random.PRNGKey(0)
    ks = jax.random.split(key, 12)
    coords = jax.random.normal(ks[0], (B, N, D), jnp.float32)
    values = jax.random.normal(ks[1], (B, N, Cin), jnp.float32)
    mask = jnp.ones((B, N), dtype=bool).at[:, -3:].set(False)

    # deterministic synthetic parameters (WeightNet: D->32->32->mid, Linear: mid*Cin->Cout)
    params = {
        "w1": 0.3 * jax.random.normal(ks[2], (D, hidden), jnp.float32),
        "b1": 0.1 * jax.random.normal(ks[3], (1, hidden), jnp.float32),
        "w2": 0.3 * jax.random.normal(ks[4], (hidden, hidden), jnp.float32),
        "b2": 0.1 * jax.random.normal(ks[5], (1, hidden), jnp.float32),
        "w3": 0.3 * jax.random.normal(ks[6], (hidden, mid), jnp.float32),
        "b3": 0.1 * jax.random.normal(ks[7], (1, mid), jnp.float32),
        "wl": 0.2 * jax.random.normal(ks[8], (mid * Cin, Cout), jnp.float32),
        "bl": 0.1 * jax.random.normal(ks[9], (1, Cout), jnp.float32),
    }

    qc, conv, qm = point_conv_forward(coords, values, mask, params,
                                      num_nbhd=num_nbhd)
    conv = jax.block_until_ready(conv)

    _, ref, _ = reference_forward(coords, values, mask, params,
                                  num_nbhd=num_nbhd)
    assert conv.shape == (B, N, Cout)
    assert jnp.allclose(conv, ref, atol=1e-4, rtol=1e-4), (
        float(jnp.max(jnp.abs(conv - ref))))

    print("KERNEL_OK")
</pallas_src>

<mosaic_0001>
module attributes {stable_mosaic.version = 11 : i64} {
  func.func @point_conv_kernel(%arg0: i32, %arg1: memref<64x7xf32, #tpu.memory_space<vmem>>, %arg2: memref<8x1xf32, #tpu.memory_space<vmem>>, %arg3: memref<7x32xf32, #tpu.memory_space<vmem>>, %arg4: memref<1x32xf32, #tpu.memory_space<vmem>>, %arg5: memref<32x32xf32, #tpu.memory_space<vmem>>, %arg6: memref<1x32xf32, #tpu.memory_space<vmem>>, %arg7: memref<32x64xf32, #tpu.memory_space<vmem>>, %arg8: memref<1x64xf32, #tpu.memory_space<vmem>>, %arg9: memref<64x8xf32, #tpu.memory_space<vmem>>, %arg10: memref<1x8xf32, #tpu.memory_space<vmem>>, %arg11: memref<8x8xf32, #tpu.memory_space<vmem>>) attributes {dimension_semantics = [#tpu.dimension_semantics<parallel>], iteration_bounds = array<i64: 4>, scalar_prefetch = 0 : i64, scratch_operands = 0 : i64, tpu.core_type = #tpu.core_type<tc>, window_params = [{transform_indices = @transform_0, window_bounds = array<i64: 64, 7>}, {transform_indices = @transform_1, window_bounds = array<i64: 8, 1>}, {pipeline_mode = #tpu.pipeline_mode<synchronous>, transform_indices = @transform_2, window_bounds = array<i64: 7, 32>}, {pipeline_mode = #tpu.pipeline_mode<synchronous>, transform_indices = @transform_3, window_bounds = array<i64: 1, 32>}, {pipeline_mode = #tpu.pipeline_mode<synchronous>, transform_indices = @transform_4, window_bounds = array<i64: 32, 32>}, {pipeline_mode = #tpu.pipeline_mode<synchronous>, transform_indices = @transform_5, window_bounds = array<i64: 1, 32>}, {pipeline_mode = #tpu.pipeline_mode<synchronous>, transform_indices = @transform_6, window_bounds = array<i64: 32, 64>}, {pipeline_mode = #tpu.pipeline_mode<synchronous>, transform_indices = @transform_7, window_bounds = array<i64: 1, 64>}, {pipeline_mode = #tpu.pipeline_mode<synchronous>, transform_indices = @transform_8, window_bounds = array<i64: 64, 8>}, {pipeline_mode = #tpu.pipeline_mode<synchronous>, transform_indices = @transform_9, window_bounds = array<i64: 1, 8>}, {transform_indices = @transform_10, window_bounds = array<i64: 8, 8>}]} {
    %c0 = arith.constant 0 : index
    %c0_0 = arith.constant 0 : index
    %0 = vector.load %arg1[%c0, %c0_0] : memref<64x7xf32, #tpu.memory_space<vmem>>, vector<64x7xf32>
    %c0_1 = arith.constant 0 : index
    %c0_2 = arith.constant 0 : index
    %1 = vector.load %arg3[%c0_1, %c0_2] : memref<7x32xf32, #tpu.memory_space<vmem>>, vector<7x32xf32>
    %cst = arith.constant dense<0.000000e+00> : vector<64x32xf32>
    %2 = tpu.matmul %0, %1, %cst {dimension_numbers = #tpu.dot_dimension_numbers<[1], [0], [0], [1], [0, 0, 1, 1], [], []>} : vector<64x7xf32>, vector<7x32xf32>, vector<64x32xf32> -> vector<64x32xf32>
    %c0_3 = arith.constant 0 : index
    %c0_4 = arith.constant 0 : index
    %3 = vector.load %arg4[%c0_3, %c0_4] : memref<1x32xf32, #tpu.memory_space<vmem>>, vector<1x32xf32>
    %4 = vector.broadcast %3 : vector<1x32xf32> to vector<64x32xf32>
    %5 = arith.addf %2, %4 : vector<64x32xf32>
    %6 = arith.negf %5 : vector<64x32xf32>
    %7 = math.exp %6 : vector<64x32xf32>
    %cst_5 = arith.constant 1.000000e+00 : f32
    %8 = vector.broadcast %cst_5 : f32 to vector<64x32xf32>
    %9 = arith.addf %8, %7 : vector<64x32xf32>
    %10 = arith.divf %8, %9 : vector<64x32xf32>
    %11 = arith.mulf %5, %10 : vector<64x32xf32>
    %c0_6 = arith.constant 0 : index
    %c0_7 = arith.constant 0 : index
    %12 = vector.load %arg5[%c0_6, %c0_7] : memref<32x32xf32, #tpu.memory_space<vmem>>, vector<32x32xf32>
    %cst_8 = arith.constant dense<0.000000e+00> : vector<64x32xf32>
    %13 = tpu.matmul %11, %12, %cst_8 {dimension_numbers = #tpu.dot_dimension_numbers<[1], [0], [0], [1], [0, 0, 1, 1], [], []>} : vector<64x32xf32>, vector<32x32xf32>, vector<64x32xf32> -> vector<64x32xf32>
    %c0_9 = arith.constant 0 : index
    %c0_10 = arith.constant 0 : index
    %14 = vector.load %arg6[%c0_9, %c0_10] : memref<1x32xf32, #tpu.memory_space<vmem>>, vector<1x32xf32>
    %15 = vector.broadcast %14 : vector<1x32xf32> to vector<64x32xf32>
    %16 = arith.addf %13, %15 : vector<64x32xf32>
    %17 = arith.negf %16 : vector<64x32xf32>
    %18 = math.exp %17 : vector<64x32xf32>
    %cst_11 = arith.constant 1.000000e+00 : f32
    %19 = vector.broadcast %cst_11 : f32 to vector<64x32xf32>
    %20 = arith.addf %19, %18 : vector<64x32xf32>
    %21 = arith.divf %19, %20 : vector<64x32xf32>
    %22 = arith.mulf %16, %21 : vector<64x32xf32>
    %c0_12 = arith.constant 0 : index
    %c0_13 = arith.constant 0 : index
    %23 = vector.load %arg7[%c0_12, %c0_13] : memref<32x64xf32, #tpu.memory_space<vmem>>, vector<32x64xf32>
    %cst_14 = arith.constant dense<0.000000e+00> : vector<64x64xf32>
    %24 = tpu.matmul %22, %23, %cst_14 {dimension_numbers = #tpu.dot_dimension_numbers<[1], [0], [0], [1], [0, 0, 1, 1], [], []>} : vector<64x32xf32>, vector<32x64xf32>, vector<64x64xf32> -> vector<64x64xf32>
    %c0_15 = arith.constant 0 : index
    %c0_16 = arith.constant 0 : index
    %25 = vector.load %arg8[%c0_15, %c0_16] : memref<1x64xf32, #tpu.memory_space<vmem>>, vector<1x64xf32>
    %26 = vector.broadcast %25 : vector<1x64xf32> to vector<64x64xf32>
    %27 = arith.addf %24, %26 : vector<64x64xf32>
    %28 = arith.negf %27 : vector<64x64xf32>
    %29 = math.exp %28 : vector<64x64xf32>
    %cst_17 = arith.constant 1.000000e+00 : f32
    %30 = vector.broadcast %cst_17 : f32 to vector<64x64xf32>
    %31 = arith.addf %30, %29 : vector<64x64xf32>
    %32 = arith.divf %30, %31 : vector<64x64xf32>
    %33 = arith.mulf %27, %32 : vector<64x64xf32>
    %34 = vector.extract_strided_slice %0 {offsets = [0, 3], sizes = [64, 1], strides = [1, 1]} : vector<64x7xf32> to vector<64x1xf32>
    %35 = vector.shape_cast %34 : vector<64x1xf32> to vector<64x1xf32>
    %36 = vector.broadcast %35 : vector<64x1xf32> to vector<64x16xf32>
    %37 = vector.extract_strided_slice %0 {offsets = [0, 4], sizes = [64, 1], strides = [1, 1]} : vector<64x7xf32> to vector<64x1xf32>
    %38 = vector.shape_cast %37 : vector<64x1xf32> to vector<64x1xf32>
    %39 = vector.broadcast %38 : vector<64x1xf32> to vector<64x16xf32>
    %40 = vector.extract_strided_slice %0 {offsets = [0, 5], sizes = [64, 1], strides = [1, 1]} : vector<64x7xf32> to vector<64x1xf32>
    %41 = vector.shape_cast %40 : vector<64x1xf32> to vector<64x1xf32>
    %42 = vector.broadcast %41 : vector<64x1xf32> to vector<64x16xf32>
    %43 = vector.extract_strided_slice %0 {offsets = [0, 6], sizes = [64, 1], strides = [1, 1]} : vector<64x7xf32> to vector<64x1xf32>
    %44 = vector.shape_cast %43 : vector<64x1xf32> to vector<64x1xf32>
    %45 = vector.broadcast %44 : vector<64x1xf32> to vector<64x16xf32>
    %46 = tpu.concatenate %36, %39, %42, %45 in 1 : vector<64x16xf32>, vector<64x16xf32>, vector<64x16xf32>, vector<64x16xf32> -> vector<64x64xf32>
    %47 = arith.mulf %46, %33 : vector<64x64xf32>
    %48 = vector.shape_cast %47 : vector<64x64xf32> to vector<8x8x64xf32>
    %cst_18 = arith.constant dense<0.000000e+00> : vector<8x64xf32>
    %49 = vector.multi_reduction <add>, %48, %cst_18 [1] : vector<8x8x64xf32> to vector<8x64xf32>
    %c0_19 = arith.constant 0 : index
    %c0_20 = arith.constant 0 : index
    %50 = vector.load %arg9[%c0_19, %c0_20] : memref<64x8xf32, #tpu.memory_space<vmem>>, vector<64x8xf32>
    %cst_21 = arith.constant dense<0.000000e+00> : vector<8x8xf32>
    %51 = tpu.matmul %49, %50, %cst_21 {dimension_numbers = #tpu.dot_dimension_numbers<[1], [0], [0], [1], [0, 0, 1, 1], [], []>} : vector<8x64xf32>, vector<64x8xf32>, vector<8x8xf32> -> vector<8x8xf32>
    %c0_22 = arith.constant 0 : index
    %c0_23 = arith.constant 0 : index
    %52 = vector.load %arg10[%c0_22, %c0_23] : memref<1x8xf32, #tpu.memory_space<vmem>>, vector<1x8xf32>
    %53 = vector.broadcast %52 : vector<1x8xf32> to vector<8x8xf32>
    %54 = arith.addf %51, %53 : vector<8x8xf32>
    %c0_24 = arith.constant 0 : index
    %c0_25 = arith.constant 0 : index
    %55 = vector.load %arg2[%c0_24, %c0_25] : memref<8x1xf32, #tpu.memory_space<vmem>>, vector<8x1xf32>
    %cst_26 = arith.constant 0.000000e+00 : f32
    %56 = vector.broadcast %cst_26 : f32 to vector<8x1xf32>
    %57 = arith.cmpf ogt, %55, %56 : vector<8x1xf32>
    %cst_27 = arith.constant 0.000000e+00 : f32
    %58 = vector.shape_cast %57 : vector<8x1xi1> to vector<8x1xi1>
    %59 = vector.broadcast %58 : vector<8x1xi1> to vector<8x8xi1>
    %60 = vector.broadcast %cst_27 : f32 to vector<8x8xf32>
    %61 = arith.select %59, %54, %60 : vector<8x8xi1>, vector<8x8xf32>
    %c0_28 = arith.constant 0 : index
    %c0_29 = arith.constant 0 : index
    %62 = vector.load %arg11[%c0_28, %c0_29] : memref<8x8xf32, #tpu.memory_space<vmem>>, vector<8x8xf32>
    tpu.vector_store %arg11[%c0_28, %c0_29], %61 {strides = array<i32>} : memref<8x8xf32, #tpu.memory_space<vmem>>, vector<8x8xf32>,
    return
  }
  func.func @transform_0(%arg0: i32) -> (i32, i32) {
    %c0_i32 = arith.constant 0 : i32
    %c0_i32_0 = arith.constant 0 : i32
    return %arg0, %c0_i32 : i32, i32
  }
  func.func @transform_1(%arg0: i32) -> (i32, i32) {
    %c0_i32 = arith.constant 0 : i32
    %c0_i32_0 = arith.constant 0 : i32
    return %arg0, %c0_i32 : i32, i32
  }
  func.func @transform_2(%arg0: i32) -> (i32, i32) {
    %c0_i32 = arith.constant 0 : i32
    %c0_i32_0 = arith.constant 0 : i32
    %c0_i32_1 = arith.constant 0 : i32
    return %c0_i32, %c0_i32_0 : i32, i32
  }
  func.func @transform_3(%arg0: i32) -> (i32, i32) {
    %c0_i32 = arith.constant 0 : i32
    %c0_i32_0 = arith.constant 0 : i32
    %c0_i32_1 = arith.constant 0 : i32
    return %c0_i32, %c0_i32_0 : i32, i32
  }
  func.func @transform_4(%arg0: i32) -> (i32, i32) {
    %c0_i32 = arith.constant 0 : i32
    %c0_i32_0 = arith.constant 0 : i32
    %c0_i32_1 = arith.constant 0 : i32
    return %c0_i32, %c0_i32_0 : i32, i32
  }
  func.func @transform_5(%arg0: i32) -> (i32, i32) {
    %c0_i32 = arith.constant 0 : i32
    %c0_i32_0 = arith.constant 0 : i32
    %c0_i32_1 = arith.constant 0 : i32
    return %c0_i32, %c0_i32_0 : i32, i32
  }
  func.func @transform_6(%arg0: i32) -> (i32, i32) {
    %c0_i32 = arith.constant 0 : i32
    %c0_i32_0 = arith.constant 0 : i32
    %c0_i32_1 = arith.constant 0 : i32
    return %c0_i32, %c0_i32_0 : i32, i32
  }
  func.func @transform_7(%arg0: i32) -> (i32, i32) {
    %c0_i32 = arith.constant 0 : i32
    %c0_i32_0 = arith.constant 0 : i32
    %c0_i32_1 = arith.constant 0 : i32
    return %c0_i32, %c0_i32_0 : i32, i32
  }
  func.func @transform_8(%arg0: i32) -> (i32, i32) {
    %c0_i32 = arith.constant 0 : i32
    %c0_i32_0 = arith.constant 0 : i32
    %c0_i32_1 = arith.constant 0 : i32
    return %c0_i32, %c0_i32_0 : i32, i32
  }
  func.func @transform_9(%arg0: i32) -> (i32, i32) {
    %c0_i32 = arith.constant 0 : i32
    %c0_i32_0 = arith.constant 0 : i32
    %c0_i32_1 = arith.constant 0 : i32
    return %c0_i32, %c0_i32_0 : i32, i32
  }
  func.func @transform_10(%arg0: i32) -> (i32, i32) {
    %c0_i32 = arith.constant 0 : i32
    %c0_i32_0 = arith.constant 0 : i32
    return %arg0, %c0_i32 : i32, i32
  }
}

</mosaic_0001>

<bundles_post_ra>
// kernel: tpu_custom_call.1
= control target key start
LH: loop header
LB: loop body
LE: loop exit
PB: predicated region body
PF: predicated region fallthrough
CT: control target
= control target key end

     0   :  { %s3240_s0 = inlined_call_operand.hbm [shape: f32[256,7], index: 0, kind: input, shape index: {}]   ;;  %s3241_s1 = inlined_call_operand.hbm [shape: f32[32,1], index: 1, kind: input, shape index: {}]   ;;  %s3242_s2 = inlined_call_operand.hbm [shape: f32[7,32], index: 2, kind: input, shape index: {}]   ;;  %s3243_s3 = inlined_call_operand.hbm [shape: f32[1,32], index: 3, kind: input, shape index: {}]   ;;  %s3244_s4 = inlined_call_operand.hbm [shape: f32[32,32], index: 4, kind: input, shape index: {}]   ;;  %s3245_s5 = inlined_call_operand.hbm [shape: f32[1,32], index: 5, kind: input, shape index: {}]   ;;  %s3246_s6 = inlined_call_operand.hbm [shape: f32[32,64], index: 6, kind: input, shape index: {}]   ;;  %s3247_s7 = inlined_call_operand.hbm [shape: f32[1,64], index: 7, kind: input, shape index: {}]   ;;  %s3248_s8 = inlined_call_operand.hbm [shape: f32[64,8], index: 8, kind: input, shape index: {}]   ;;  %s3249_s9 = inlined_call_operand.hbm [shape: f32[1,8], index: 9, kind: input, shape index: {}]   ;;  %s3250_s10 = inlined_call_operand.hbm [shape: f32[32,8], index: 10, kind: output, shape index: {}]  }
   0x1   :  { %3258 = sst [smem:[#allocation28_spill]] %s3240_s0 }
   0x2   :  { %3259 = sst [smem:[#allocation29_spill]] %s3242_s2 }
   0x3   :  { %3260 = sst [smem:[#allocation30_spill]] %s3243_s3 }
   0x4   :  { %3261 = sst [smem:[#allocation31_spill]] %s3244_s4 }
   0x5   :  { %3262 = sst [smem:[#allocation32_spill]] %s3245_s5 }
   0x6   :  { %3263 = sst [smem:[#allocation33_spill]] %s3246_s6 }
   0x7   :  { %3264 = sst [smem:[#allocation34_spill]] %s3247_s7 }
   0x8   :  { %3265 = sst [smem:[#allocation35_spill]] %s3250_s10 }
   0x9   :  { %15 = vsyncpa [#allocation3], 0 }
   0xa   :  { %17 = vsyncpa [#allocation3 + $0x1], 0 }
   0xb   :  { %18 = vsyncpa [#allocation6], 0 }
   0xc   :  { %20 = vsyncpa [#allocation6 + $0x1], 0 }
   0xd   :  { %21 = vsyncpa [#allocation9], 0 }
   0xe   :  { %22 = vsyncpa [#allocation12], 0 }
   0xf   :  { %23 = vsyncpa [#allocation15], 0 }
  0x10   :  { %24 = vsyncpa [#allocation18], 0 }
  0x11   :  { %25 = vsyncpa [#allocation4], 0 }
  0x12   :  { %27 = vsyncpa [#allocation4 + $0x1], 0  ;;  %s2588_s13 = smov 0   ;;  %s2590_s14 = smov 0  }
  0x13   :  { %s2592_s15 = smov 0   ;;  %s2594_s16 = smov 0  }
  0x14 LB: > { %s2512_s17 = smov [#allocation7]   ;;  %s2609_s19 = sadd.s32 4294967295, %s2510_s16   ;;  %s2510_s16 = sphi %s2594_s16, %s3303_s16   ;;  %s2506_s15 = sphi %s2592_s15, %s3302_s15   ;;  %s2502_s14 = sphi %s2590_s14, %s3301_s14   ;;  %s2498_s13 = sphi %s2588_s13, %s3300_s13  }
  0x15   : > { %s297_s18 = sshll.u32 %s2512_s17, 4  ;;  %p1643_p0 = scmp.ge.s32.totalorder %s2510_s16, 1  ;;  %s2614_s18 = int_to_ptr.vmem [resolvable:$true] %s297_s18 }
  0x16   : > { %p3252_p1 = scmp.eq.s32.totalorder %s2609_s19, 0  ;;  %p284_p2 = scmp.lt.s32.totalorder %s2510_s16, 5 }
  0x17   : > { %s2513_s21 = smov [#allocation8]   ;;  %s2514_s23 = smov [#allocation11]  }
  0x18   : > { %p2616_p3 = pnand %p1643_p0, %p284_p2  ;;  %s308_s22 = sshll.u32 %s2513_s21, 4  ;;  %s2622_s22 = int_to_ptr.vmem [resolvable:$true] %s308_s22 }
  0x19   : > { %s332_s24 = sshll.u32 %s2514_s23, 4  ;;  %s2515_s26 = smov [#allocation14]   ;;  %s2630_s24 = int_to_ptr.vmem [resolvable:$true] %s332_s24 }
  0x1a   : > { %s3266_s20 = scalar_select %p2616_p3, 1, 0 }
  0x1b   : > { %p1912_p4 = pneg %p2616_p3  ;;  %s2632_s27 = sshll.u32 %s2515_s26, 4  ;;  %s357_s27 = int_to_ptr.vmem [resolvable:$true] %s2632_s27 }
  0x1c   : > { %s3268_s2 = sld [smem:[#allocation29_spill]] }
  0x1d   : > { %p2626_p5 = pnand %p1912_p4, %p3252_p1 }
  0x1f   : > { %p2642_p7 = pneg %p2626_p5 }
  0x22   : > { %s2136_s30 = scalar_lea.hbm %s3268_s2, 128 }
  0x23   : > { %p2137_p6 = scmp.ne.s32.totalorder %s3268_s2, %s2136_s30  ;;  %p2143_p10 = scmp.lt.u32.totalorder %s2136_s30, %s3268_s2 }
  0x25   : > { %p2139_p8 = pnand %p2642_p7, %p2137_p6 }
  0x27   : > { %p2140_p9 = pneg %p2139_p8 }
  0x29   : > { %p2145_p11 = pnand %p2143_p10, %p2140_p9 }
  0x2b   : > { %2148 = shalt.err (!%p2145_p11)
}
  0x2c   : > { %s2149_s26 = scalar_lea.vmem %s2614_s18, 128  ;;  %p2157_p2 = scmp.lt.s32.totalorder %s2614_s18, %s2614_s18 }
  0x2d   : > { %p2150_p12 = scmp.ne.s32.totalorder %s2614_s18, %s2149_s26  ;;  %p2158_p4 = scmp.lt.s32.totalorder %s2149_s26, %s2149_s26 }
  0x2f   : > { %p2152_p13 = pnand %p2150_p12, %p2642_p7  ;;  %p2159_p6 = por %p2158_p4, %p2157_p2 }
  0x31   : > { %p2153_p0 = pneg %p2152_p13 }
  0x33   : > { %p2160_p8 = pnand %p2159_p6, %p2153_p0 }
  0x35   : > { %2163 = shalt.err (!%p2160_p8)
}
  0x36   : > { %1915 = dma.hbm_to_vmem [thread:$0]  (!%p2626_p5), %s3268_s2, 128, %s2614_s18, [#allocation6]  }
  0x37   : > { %s3270_s3 = sld [smem:[#allocation30_spill]] }
  0x3d   : > { %s2164_s12 = scalar_lea.hbm %s3270_s3, 16 }
  0x3e   : > { %p2165_p9 = scmp.ne.s32.totalorder %s3270_s3, %s2164_s12  ;;  %p2171_p12 = scmp.lt.u32.totalorder %s2164_s12, %s3270_s3 }
  0x40   : > { %p2167_p10 = pnand %p2165_p9, %p2642_p7 }
  0x42   : > { %p2168_p11 = pneg %p2167_p10 }
  0x44   : > { %p2173_p13 = pnand %p2171_p12, %p2168_p11 }
  0x46   : > { %2176 = shalt.err (!%p2173_p13)
}
  0x47   : > { %s2177_s18 = scalar_lea.vmem %s2622_s22, 16  ;;  %s2184_s28 = scalar_lea.vmem %s2622_s22, 32 }
  0x48   : > { %p2178_p0 = scmp.ne.s32.totalorder %s2622_s22, %s2177_s18  ;;  %p2185_p6 = scmp.lt.s32.totalorder %s2622_s22, %s2622_s22 }
  0x49   : > { %p2186_p8 = scmp.lt.s32.totalorder %s2184_s28, %s2177_s18 }
  0x4a   : > { %p2180_p2 = pnand %p2178_p0, %p2642_p7 }
  0x4b   : > { %p2187_p9 = por %p2186_p8, %p2185_p6 }
  0x4c   : > { %p2181_p4 = pneg %p2180_p2 }
  0x4e   : > { %p2188_p10 = pnand %p2187_p9, %p2181_p4 }
  0x50   : > { %2191 = shalt.err (!%p2188_p10)
}
  0x51   : > { %1918 = dma.hbm_to_vmem [thread:$0]  (!%p2626_p5), %s3270_s3, 16, %s2622_s22, [#allocation9]  }
  0x52   : > { %s3271_s5 = sld [smem:[#allocation32_spill]] }
  0x58   : > { %s2192_s12 = scalar_lea.hbm %s3271_s5, 16 }
  0x59   : > { %p2193_p11 = scmp.ne.s32.totalorder %s3271_s5, %s2192_s12  ;;  %p2199_p0 = scmp.lt.u32.totalorder %s2192_s12, %s3271_s5 }
  0x5b   : > { %p2195_p12 = pnand %p2193_p11, %p2642_p7 }
  0x5d   : > { %p2196_p13 = pneg %p2195_p12 }
  0x5f   : > { %p2201_p2 = pnand %p2199_p0, %p2196_p13 }
  0x61   : > { %2204 = shalt.err (!%p2201_p2)
}
  0x62   : > { %s2205_s22 = scalar_lea.vmem %s2630_s24, 16  ;;  %s2212_s28 = scalar_lea.vmem %s2630_s24, 32 }
  0x63   : > { %p2206_p4 = scmp.ne.s32.totalorder %s2630_s24, %s2205_s22  ;;  %p2213_p9 = scmp.lt.s32.totalorder %s2630_s24, %s2630_s24 }
  0x64   : > { %p2214_p10 = scmp.lt.s32.totalorder %s2212_s28, %s2205_s22 }
  0x65   : > { %p2208_p6 = pnand %p2206_p4, %p2642_p7 }
  0x66   : > { %p2215_p11 = por %p2214_p10, %p2213_p9 }
  0x67   : > { %p2209_p8 = pneg %p2208_p6 }
  0x69   : > { %p2216_p12 = pnand %p2215_p11, %p2209_p8 }
  0x6b   : > { %2219 = shalt.err (!%p2216_p12)
}
  0x6c   : > { %1924 = dma.hbm_to_vmem [thread:$0]  (!%p2626_p5), %s3271_s5, 16, %s2630_s24, [#allocation12]  }
  0x6d   : > { %s2516_s30 = smov [#allocation10]   ;;  %s3272_s7 = sld [smem:[#allocation34_spill]] }
  0x6e   : > { %s318_s11 = sshll.u32 %s2516_s30, 4  ;;  %s319_s11 = int_to_ptr.vmem [resolvable:$true] %s318_s11 }
  0x73   : > { %s2220_s23 = scalar_lea.hbm %s3272_s7, 16 }
  0x74   : > { %p2221_p13 = scmp.ne.s32.totalorder %s3272_s7, %s2220_s23  ;;  %p2227_p4 = scmp.lt.u32.totalorder %s2220_s23, %s3272_s7 }
  0x76   : > { %p2223_p0 = pnand %p2221_p13, %p2642_p7 }
  0x78   : > { %p2224_p2 = pneg %p2223_p0 }
  0x7a   : > { %p2229_p6 = pnand %p2227_p4, %p2224_p2 }
  0x7c   : > { %2232 = shalt.err (!%p2229_p6)
}
  0x7d   : > { %s2233_s24 = scalar_lea.vmem %s357_s27, 16  ;;  %s2240_s10 = scalar_lea.vmem %s357_s27, 32 }
  0x7e   : > { %p2234_p8 = scmp.ne.s32.totalorder %s357_s27, %s2233_s24  ;;  %p2241_p11 = scmp.lt.s32.totalorder %s357_s27, %s357_s27 }
  0x7f   : > { %p2242_p12 = scmp.lt.s32.totalorder %s2240_s10, %s2233_s24 }
  0x80   : > { %p2236_p9 = pnand %p2234_p8, %p2642_p7 }
  0x81   : > { %p2243_p1 = por %p2242_p12, %p2241_p11 }
  0x82   : > { %p2237_p10 = pneg %p2236_p9 }
  0x84   : > { %p2244_p3 = pnand %p2243_p1, %p2237_p10 }
  0x86   : > { %2247 = shalt.err (!%p2244_p3)
}
  0x87   : > { %1930 = dma.hbm_to_vmem [thread:$0]  (!%p2626_p5), %s3272_s7, 16, %s357_s27, [#allocation15]  }
  0x88   : > { %s3273_s4 = sld [smem:[#allocation31_spill]] }
  0x8e   : > { %s2248_s23 = scalar_lea.hbm %s3273_s4, 512 }
  0x8f   : > { %p2249_p13 = scmp.ne.s32.totalorder %s3273_s4, %s2248_s23  ;;  %p2255_p3 = scmp.lt.u32.totalorder %s2248_s23, %s3273_s4 }
  0x91   : > { %p2251_p0 = pnand %p2249_p13, %p2642_p7 }
  0x93   : > { %p2252_p1 = pneg %p2251_p0 }
  0x95   : > { %p2257_p2 = pnand %p2255_p3, %p2252_p1 }
  0x97   : > { %2260 = shalt.err (!%p2257_p2)
}
  0x98   : > { %s2261_s24 = scalar_lea.vmem %s319_s11, 512  ;;  %p2269_p9 = scmp.lt.s32.totalorder %s319_s11, %s319_s11 }
  0x99   : > { %p2262_p4 = scmp.ne.s32.totalorder %s319_s11, %s2261_s24  ;;  %p2270_p10 = scmp.lt.s32.totalorder %s2261_s24, %s2261_s24 }
  0x9b   : > { %p2264_p6 = pnand %p2262_p4, %p2642_p7  ;;  %p2271_p11 = por %p2270_p10, %p2269_p9 }
  0x9d   : > { %p2265_p8 = pneg %p2264_p6 }
  0x9f   : > { %p2272_p12 = pnand %p2271_p11, %p2265_p8 }
  0xa1   : > { %2275 = shalt.err (!%p2272_p12)
}
  0xa2   : > { %s3254_s27 = smov 128   ;;  %s3255_s10 = smov 8  }
  0xa3   : > { %1921 = dma.hbm_to_vmem [thread:$0]  (!%p2626_p5), %s3273_s4, 512, %s319_s11, [#allocation9], %s3254_s27, %s3254_s27, %s3255_s10  }
  0xa4   : > { %s2519_s12 = smov [#allocation13]   ;;  %s2520_s23 = smov [#allocation16]  }
  0xa5   : > { %s342_s21 = sshll.u32 %s2519_s12, 4  ;;  %s366_s26 = sshll.u32 %s2520_s23, 4  ;;  %s343_s21 = int_to_ptr.vmem [resolvable:$true] %s342_s21  ;;  %s367_s26 = int_to_ptr.vmem [resolvable:$true] %s366_s26 }
  0xa6   : > { %s3274_s6 = sld [smem:[#allocation33_spill]] }
  0xac   : > { %s2276_s28 = scalar_lea.hbm %s3274_s6, 512 }
  0xad   : > { %p2277_p13 = scmp.ne.s32.totalorder %s3274_s6, %s2276_s28  ;;  %p2283_p3 = scmp.lt.u32.totalorder %s2276_s28, %s3274_s6 }
  0xaf   : > { %p2279_p0 = pnand %p2277_p13, %p2642_p7 }
  0xb1   : > { %p2280_p1 = pneg %p2279_p0 }
  0xb3   : > { %p2285_p2 = pnand %p2283_p3, %p2280_p1 }
  0xb5   : > { %2288 = shalt.err (!%p2285_p2)
}
  0xb6   : > { %s2289_s11 = scalar_lea.vmem %s343_s21, 512  ;;  %p2297_p9 = scmp.lt.s32.totalorder %s343_s21, %s343_s21 }
  0xb7   : > { %p2290_p4 = scmp.ne.s32.totalorder %s343_s21, %s2289_s11  ;;  %p2298_p10 = scmp.lt.s32.totalorder %s2289_s11, %s2289_s11 }
  0xb9   : > { %p2292_p6 = pnand %p2290_p4, %p2642_p7  ;;  %p2299_p11 = por %p2298_p10, %p2297_p9 }
  0xbb   : > { %p2293_p8 = pneg %p2292_p6 }
  0xbd   : > { %p2300_p12 = pnand %p2299_p11, %p2293_p8 }
  0xbf   : > { %2303 = shalt.err (!%p2300_p12)
}
  0xc0   : > { %1927 = dma.hbm_to_vmem [thread:$0]  (!%p2626_p5), %s3274_s6, 512, %s343_s21, [#allocation12], %s3254_s27, %s3254_s27, %s3255_s10  }
  0xc1   : > { %s2304_s30 = scalar_lea.hbm %s3248_s8, 1024 }
  0xc2   : > { %p2305_p13 = scmp.ne.s32.totalorder %s3248_s8, %s2304_s30  ;;  %p2311_p3 = scmp.lt.u32.totalorder %s2304_s30, %s3248_s8 }
  0xc4   : > { %p2307_p0 = pnand %p2305_p13, %p2642_p7 }
  0xc6   : > { %p2308_p1 = pneg %p2307_p0 }
  0xc8   : > { %p2313_p2 = pnand %p2311_p3, %p2308_p1 }
  0xca   : > { %2316 = shalt.err (!%p2313_p2)
}
  0xcb   : > { %s2317_s28 = scalar_lea.vmem %s367_s26, 1024  ;;  %p2325_p9 = scmp.lt.s32.totalorder %s367_s26, %s367_s26 }
  0xcc   : > { %p2318_p4 = scmp.ne.s32.totalorder %s367_s26, %s2317_s28  ;;  %p2326_p10 = scmp.lt.s32.totalorder %s2317_s28, %s2317_s28 }
  0xce   : > { %p2320_p6 = pnand %p2318_p4, %p2642_p7  ;;  %p2327_p11 = por %p2326_p10, %p2325_p9 }
  0xd0   : > { %p2321_p8 = pneg %p2320_p6 }
  0xd2   : > { %p2328_p12 = pnand %p2327_p11, %p2321_p8 }
  0xd4   : > { %2331 = shalt.err (!%p2328_p12)
}
  0xd5   : > { %1933 = dma.hbm_to_vmem [thread:$0]  (!%p2626_p5), %s3248_s8, 1024, %s367_s26, [#allocation15], %s3254_s27, %s3254_s27, %s3255_s10  }
  0xd6   : > { %s2521_s11 = smov [#allocation17]   ;;  %s2332_s29 = scalar_lea.hbm %s3249_s9, 16 }
  0xd7   : > { %s380_s2 = sshll.u32 %s2521_s11, 4  ;;  %p2333_p13 = scmp.ne.s32.totalorder %s3249_s9, %s2332_s29  ;;  %s381_s2 = int_to_ptr.vmem [resolvable:$true] %s380_s2 }
  0xd8   : > { %p2339_p3 = scmp.lt.u32.totalorder %s2332_s29, %s3249_s9 }
  0xd9   : > { %p2335_p0 = pnand %p2333_p13, %p2642_p7 }
  0xdb   : > { %p2336_p1 = pneg %p2335_p0 }
  0xdd   : > { %p2341_p2 = pnand %p2339_p3, %p2336_p1 }
  0xdf   : > { %2344 = shalt.err (!%p2341_p2)
}
  0xe0   : > { %s2345_s26 = scalar_lea.vmem %s381_s2, 16  ;;  %s2352_s22 = scalar_lea.vmem %s381_s2, 32 }
  0xe1   : > { %p2346_p4 = scmp.ne.s32.totalorder %s381_s2, %s2345_s26  ;;  %p2353_p9 = scmp.lt.s32.totalorder %s381_s2, %s381_s2 }
  0xe2   : > { %p2354_p10 = scmp.lt.s32.totalorder %s2352_s22, %s2345_s26 }
  0xe3   : > { %p2348_p6 = pnand %p2346_p4, %p2642_p7 }
  0xe4   : > { %p2355_p11 = por %p2354_p10, %p2353_p9 }
  0xe5   : > { %p2349_p8 = pneg %p2348_p6 }
  0xe7   : > { %p2356_p12 = pnand %p2355_p11, %p2349_p8 }
  0xe9   : > { %2359 = shalt.err (!%p2356_p12)
}
  0xea   : > { %1936 = dma.hbm_to_vmem [thread:$0]  (!%p2626_p5), %s3249_s9, 16, %s381_s2, [#allocation18]  }
  0xeb   : > { %s1642_s17 = sadd.s32 4294967294, %s2510_s16   ;;  %s2813_s25 = sadd.s32 1, %s2510_s16  }
  0xec   : > { %s37_s24 = ssub.s32 %s2510_s16, %s2813_s25  ;;  %s40_s11 = sadd.s32 1, %s2506_s15 }
  0xed   : > { %p38_p7 = scmp.eq.s32.totalorder %s37_s24, 0  ;;  %p47_p13 = scmp.ne.s32.totalorder %s2506_s15, %s2502_s14 }
  0xee   : > { %p48_p0 = scmp.eq.s32.totalorder %s2510_s16, 0  ;;  %p53_p1 = scmp.ne.s32.totalorder %s2502_s14, %s2498_s13 }
  0xef   : > { %s2824_s3 = scalar_select %p38_p7, %s2506_s15, %s40_s11  }
  0xf0   : > { %p2826_p3 = por %p48_p0, %p47_p13  ;;  %p3276_p2 = scmp.eq.s32.totalorder %s2609_s19, 0 }
  0xf1   : > { %p271_p4 = scmp.eq.s32.totalorder %s2609_s19, 3  ;;  %p277_p6 = scmp.eq.s32.totalorder %s1642_s17, 3 }
  0xf2   : > { %p2832_p5 = por %p3276_p2, %p53_p1  ;;  %p1956_p8 = scmp.lt.s32.totalorder %s2510_s16, 4 }
  0xf3   : > { %s2839_s29 = sand.u32 1, %s2506_s15   ;;  %p2841_p9 = por %p271_p4, %p47_p13 }
  0xf4   : > { %s3277_s2 = scalar_select %p2832_p5, 1, 0 }
  0xf5   : > { %s3278_s30 = scalar_select %p2841_p9, 1, 0 }
  0xf6   : > { %p2845_p10 = por %p277_p6, %p53_p1  ;;  %s1653_s23 = sshll.u32 %s2839_s29, 6 }
  0xf7   : > { %s1728_s18 = sshll.u32 %s2510_s16, 10  ;;  %s3280_s0 = sld [smem:[#allocation28_spill]] }
  0xf8   : > { %s3279_s12 = scalar_select %p2845_p10, 1, 0 }
  0xf9   : > { %s395_s21 = scalar_lea.vmem [#allocation2], %s1653_s23  ;;  %p2860_p11 = pnand %p1956_p8, %p2826_p3 }
  0xfa   : > { %s402_s17 = sshll.u32 %s395_s21, 4  ;;  %s1656_s27 = sshll.u32 %s2839_s29, 3  ;;  %s2856_s17 = int_to_ptr.vmem [resolvable:$true] %s402_s17 }
  0xfb   : > { %s392_s26 = scalar_lea.sflag [#allocation3], %s2839_s29  ;;  %p2362_p7 = pneg %p2860_p11 }
  0xfd   : > { %s2854_s28 = scalar_lea.hbm %s3280_s0, %s1728_s18  ;;  %s2365_s5 = scalar_lea.hbm %s3280_s0, 4096 }
  0xfe   : > { %s2360_s18 = scalar_lea.hbm %s2854_s28, 1024  ;;  %p2366_p1 = scmp.lt.u32.totalorder %s2854_s28, %s3280_s0 }
  0xff   : > { %p2361_p12 = scmp.ne.s32.totalorder %s2854_s28, %s2360_s18  ;;  %p2367_p3 = scmp.lt.u32.totalorder %s2365_s5, %s2360_s18 }
 0x100   : > { %p2369_p4 = scmp.lt.u32.totalorder %s2360_s18, %s2854_s28 }
 0x101   : > { %p2363_p13 = pnand %p2362_p7, %p2361_p12  ;;  %p2368_p2 = por %p2367_p3, %p2366_p1 }
 0x103   : > { %p2364_p0 = pneg %p2363_p13  ;;  %p2370_p6 = por %p2369_p4, %p2368_p2 }
 0x105   : > { %p2371_p8 = pnand %p2370_p6, %p2364_p0 }
 0x107   : > { %2374 = shalt.err (!%p2371_p8)
}
 0x108   : > { %s2375_s11 = scalar_lea.vmem %s2856_s17, 1024  ;;  %s2522_s23 = smov [#allocation2]  }
 0x109   : > { %p2376_p12 = scmp.ne.s32.totalorder %s2856_s17, %s2375_s11  ;;  %s2380_s22 = sshll.u32 %s2522_s23, 4  ;;  %s2381_s22 = int_to_ptr.vmem [resolvable:$false] %s2380_s22 }
 0x10a   : > { %s2382_s10 = scalar_lea.vmem %s2381_s22, 2048  ;;  %p2383_p9 = scmp.lt.s32.totalorder %s2856_s17, %s2381_s22 }
 0x10b   : > { %p2378_p13 = pnand %p2376_p12, %p2362_p7  ;;  %p2384_p1 = scmp.lt.s32.totalorder %s2382_s10, %s2375_s11 }
 0x10d   : > { %p2379_p10 = pneg %p2378_p13  ;;  %p2385_p3 = por %p2384_p1, %p2383_p9 }
 0x10f   : > { %p2386_p2 = pnand %p2385_p3, %p2379_p10 }
 0x111   : > { %2389 = shalt.err (!%p2386_p2)
}
 0x112   : > { %s3282_s18 = smov 8   ;;  %s3283_s5 = smov 128  }
 0x113   : > { %1940 = dma.hbm_to_vmem [thread:$0]  (!%p2860_p11), %s2854_s28, 1024, %s2856_s17, %s392_s26, %s3283_s5, %s3283_s5, %s3282_s18  }
 0x114   : > { %s1657_s21 = sshll.u32 %s2510_s16, 7  ;;  %s416_s10 = scalar_lea.vmem [#allocation5], %s1656_s27 }
 0x115   : > { %s2901_s22 = scalar_lea.hbm %s3241_s1, %s1657_s21  ;;  %s423_s0 = sshll.u32 %s416_s10, 4  ;;  %s424_s0 = int_to_ptr.vmem [resolvable:$true] %s423_s0 }
 0x116   : > { %s3284_s4 = sand.u32 1, %s2510_s16   ;;  %s2390_s7 = scalar_lea.hbm %s2901_s22, 128 }
 0x117   : > { %s413_s6 = scalar_lea.sflag [#allocation6], %s3284_s4  ;;  %p2391_p9 = scmp.ne.s32.totalorder %s2901_s22, %s2390_s7 }
 0x118   : > { %s2395_s26 = scalar_lea.hbm %s3241_s1, 512  ;;  %p2396_p4 = scmp.lt.u32.totalorder %s2901_s22, %s3241_s1 }
 0x119   : > { %p2393_p10 = pnand %p2391_p9, %p2362_p7  ;;  %p2397_p6 = scmp.lt.u32.totalorder %s2395_s26, %s2390_s7 }
 0x11a   : > { %p2399_p12 = scmp.lt.u32.totalorder %s2390_s7, %s2901_s22 }
 0x11b   : > { %p2394_p0 = pneg %p2393_p10  ;;  %p2398_p8 = por %p2397_p6, %p2396_p4 }
 0x11d   : > { %p2400_p13 = por %p2399_p12, %p2398_p8 }
 0x11f   : > { %p2401_p1 = pnand %p2400_p13, %p2394_p0 }
 0x121   : > { %2404 = shalt.err (!%p2401_p1)
}
 0x122   : > { %s2405_s4 = scalar_lea.vmem %s424_s0, 128  ;;  %s2523_s27 = smov [#allocation5]  }
 0x123   : > { %p2406_p3 = scmp.ne.s32.totalorder %s424_s0, %s2405_s4  ;;  %s2410_s5 = sshll.u32 %s2523_s27, 4  ;;  %s2411_s5 = int_to_ptr.vmem [resolvable:$false] %s2410_s5 }
 0x124   : > { %s2412_s21 = scalar_lea.vmem %s2411_s5, 256  ;;  %p2413_p10 = scmp.lt.s32.totalorder %s424_s0, %s2411_s5 }
 0x125   : > { %p2408_p2 = pnand %p2406_p3, %p2362_p7  ;;  %p2414_p5 = scmp.lt.s32.totalorder %s2412_s21, %s2405_s4 }
 0x127   : > { %p2409_p9 = pneg %p2408_p2  ;;  %p2415_p4 = por %p2414_p5, %p2413_p10 }
 0x129   : > { %p2416_p6 = pnand %p2415_p4, %p2409_p9 }
 0x12b   : > { %2419 = shalt.err (!%p2416_p6)
}
 0x12c   : > { %1943 = dma.hbm_to_vmem [thread:$0]  (!%p2860_p11), %s2901_s22, 128, %s424_s0, %s413_s6  }
 0x12d   : > { %p3285_p0 = scmp.ne.s32.totalorder %s3266_s20, 0 }
 0x12e   : > { %s2929_s7 = sand.u32 (!%p3285_p0), 1, %s2502_s14   ;;  %p3286_p5 = scmp.ne.s32.totalorder (!%p3285_p0), %s3277_s2, 0 }
 0x12f   : > { %432 = sbr.rel (%p3285_p0) target bundleno = 1327 (0x52f), region = 60  ;;  %s1659_s23 = sshll.u32 (!%p3285_p0), %s2929_s7, 6 }
 0x130   : > { %s435_s11 = scalar_lea.sflag (!%p3285_p0), [#allocation3], %s2929_s7  ;;  %s2933_s10 = scalar_lea.vmem (!%p3285_p0), [#allocation2], %s1659_s23 }
 0x136   : > { %2465 = dma.done.wait (%p3286_p5), %s435_s11, 1024  }
 0x137   : > { %2467 = vsyncadd (%p3286_p5), %s435_s11, 4294966272  ;;  %s443_s0 = sand.u32 1, %s2609_s19   ;;  %s1660_s6 = sshll.u32 %s2929_s7, 3 }
 0x138   : > { %s444_s20 = scalar_lea.sflag [#allocation6], %s443_s0  ;;  %s2943_s24 = scalar_lea.vmem [#allocation5], %s1660_s6 }
 0x139   : > { %2469 = dma.done.wait (%p3286_p5), %s444_s20, 128  }
 0x13a   : > { %2471 = vsyncadd (%p3286_p5), %s444_s20, 4294967168  ;;  %p3287_p11 = scmp.eq.s32.totalorder %s2609_s19, 0 }
 0x13c   : > { %2473 = dma.done.wait (%p3287_p11), [#allocation6], 128   ;;  %p3288_p7 = pmov %p3287_p11 }
 0x13e   : > { %2475 = vsyncadd (%p3288_p7), [#allocation6], 4294967168  ;;  %p3289_p8 = pmov %p3288_p7 }
 0x13f   : > { %p3290_p12 = pmov %p3288_p7 }
 0x140   : > { %2477 = dma.done.wait (%p3289_p8), [#allocation9], 528  }
 0x141   : > { %2479 = vsyncadd (%p3290_p12), [#allocation9], 4294966768  ;;  %p3291_p13 = pmov %p3288_p7 }
 0x142   : > { %p3292_p1 = pmov %p3288_p7 }
 0x143   : > { %2481 = dma.done.wait (%p3291_p13), [#allocation12], 528  }
 0x144   : > { %2483 = vsyncadd (%p3292_p1), [#allocation12], 4294966768  ;;  %p3293_p3 = pmov %p3292_p1 }
 0x145   : > { %p3294_p2 = pmov %p3292_p1 }
 0x146   : > { %2485 = dma.done.wait (%p3293_p3), [#allocation15], 1040  }
 0x147   : > { %2487 = vsyncadd (%p3294_p2), [#allocation15], 4294966256  ;;  %p3295_p9 = pmov %p3292_p1 }
 0x148   : > { %p3296_p10 = pmov %p3292_p1 }
 0x149   : > { %2489 = dma.done.wait (%p3295_p9), [#allocation18], 16  }
 0x14a   : > { %2491 = vsyncadd (%p3296_p10), [#allocation18], 4294967280  ;;  %vm563_vm0 = vcmask 1046528   ;;  %v530_v0 = vld [vmem:[#allocation7] sm:$0x7f]  ;;  %v2970_v1 = vld [vmem:[%s2933_s10] sm:$0xff] }
 0x14b   : > { %vm538_vm1 = vcmask 56320   ;;  %v2973_v2 = vld [vmem:[%s2933_s10 + $0x20] sm:$0xff]  ;;  %1771 = vmatprep.subr.msk.mxu0 %vm563_vm0, %v530_v0  ;;  %1872 = vmatprep.subr.msk.mxu1 %vm563_vm0, %v530_v0  ;;  %v2976_v3 = vld [vmem:[%s2933_s10 + $0x8] sm:$0xff]  ;;  %v2982_v5 = vld [vmem:[%s2933_s10 + $0x10] sm:$0xff]  ;;  %vm739_vm2 = vcmask 261120   ;;  %vm2529_vm3 = vmmov 0  }
 0x14c   : > { %v2979_v4 = vld [vmem:[%s2933_s10 + $0x28] sm:$0xff]  ;;  %1772 = vmatpush3.msk.msra.mxu0 %vm563_vm0, %v530_v0  ;;  %1873 = vmatpush3.msk.msra.mxu1 %vm563_vm0, %v530_v0  ;;  %v2985_v6 = vld [vmem:[%s2933_s10 + $0x30] sm:$0xff]  ;;  %v3000_v7 = vld [vmem:[%s2933_s10 + $0x18] sm:$0xff]  ;;  %vm1249_vm5 = vcmask 130048   ;;  %vm1266_vm6 = vcmask 392192   ;;  %vm1283_vm7 = vcmask 523264  }
 0x14d   : > { %1773 = vmatprep.mubr.msk.f32.mxu0 %vm538_vm1, %v2970_v1  ;;  %1779 = vmatprep.mubr.msk.f32.mxu1 %vm538_vm1, %v2973_v2  ;;  %v3003_v8 = vld [vmem:[%s2933_s10 + $0x38] sm:$0xff]  ;;  %v729_v10 = vld [vmem:[#allocation10 + $0x8] sm:$0xff]  ;;  %v730_v12 = vld [vmem:[#allocation10 + $0x10] sm:$0xff]  ;;  %vm1363_vm8 = vcmask 1041409   ;;  %vm1365_vm9 = vcmask 1042434   ;;  %vm1367_vm10 = vcmask 1043459  }
 0x14e   : > { %1774 = vmatmul.mubr.msk.f32.vlgmr.msra.gmra.mrb[0].mxu0 %vm538_vm1, %v2976_v3  ;;  %1780 = vmatmul.mubr.msk.f32.vlgmr.msra.gmra.mrb[0].mxu1 %vm538_vm1, %v2979_v4  ;;  %v728_v9 = vld [vmem:[#allocation10] sm:$0xff]  ;;  %v731_v13 = vld [vmem:[#allocation10 + $0x18] sm:$0xff]  ;;  %vm1369_vm11 = vcmask 1044484   ;;  %vm1371_vm12 = vcmask 1045509   ;;  %vm1373_vm13 = vcmask 1046534   ;;  %vm1375_vm14 = vcmask 1047559  }
 0x14f   : > { %1776 = vmatprep.mubr.msk.f32.mxu0 %vm538_vm1, %v2982_v5  ;;  %1782 = vmatprep.mubr.msk.f32.mxu1 %vm538_vm1, %v2985_v6  ;;  %v1844_v11 = vpack.c.bf16 %v729_v10, %v728_v9  ;;  %v1848_v14 = vpack.c.bf16 %v731_v13, %v730_v12  ;;  %v1670_v15 = vld [vmem:[#allocation8] ss:$0 sm:$0xff]  ;;  %s1725_s2 = sshll.u32 %s2609_s19, 7  ;;  %s520_s22 = scalar_lea.vmem [#allocation19], %s1660_s6  ;;  %vm1457_vm0 = vcmask 64512  }
 0x150   : > { %s1473_s28 = sshll.u32 %s520_s22, 4  ;;  %s3297_s29 = sld [smem:[#allocation35_spill]]  ;;  %s3199_s28 = int_to_ptr.vmem [resolvable:$true] %s1473_s28 }
 0x151   : > { %1845 = vmatprep.subr.bf16.mxu1 %v1844_v11  ;;  %s1460_s19 = scalar_lea.sflag [#allocation4], %s2929_s7  ;;  %s2420_s4 = scalar_lea.vmem %s3199_s28, 128 }
 0x152   : > { %1777 = vmatmul.mubr.msk.f32.gmra.mrb[2].mxu0 %vm538_vm1, %v3000_v7  ;;  %1783 = vmatmul.mubr.msk.f32.gmra.mrb[2].mxu1 %vm538_vm1, %v3003_v8  ;;  %p2421_p4 = scmp.ne.s32.totalorder %s3199_s28, %s2420_s4  ;;  %p3298_p6 = scmp.ne.s32.totalorder %s3278_s30, 0 }
 0x153   : > { %1847 = vmatpush3.bf16.msra.mxu1 %v1844_v11  ;;  %s2532_s27 = smov [#allocation19]  }
 0x154   : > { %1849 = vmatprep.subr.bf16.mxu1 %v1848_v14  ;;  %p2422_p0 = pnand %p2421_p4, %p3298_p6  ;;  %s2424_s5 = sshll.u32 %s2532_s27, 4  ;;  %s2425_s5 = int_to_ptr.vmem [resolvable:$false] %s2424_s5 }
 0x155   : > { %s2426_s21 = scalar_lea.vmem %s2425_s5, 256  ;;  %p2427_p11 = scmp.lt.s32.totalorder %s3199_s28, %s2425_s5 }
 0x156   : > { %s3197_s18 = scalar_lea.hbm %s3297_s29, %s1725_s2  ;;  %p2423_p5 = pneg %p2422_p0 }
 0x157   : > { %1851 = vmatpush3.bf16.msra.mxu1 %v1848_v14  ;;  %p2428_p7 = scmp.lt.s32.totalorder %s2426_s21, %s2420_s4 }
 0x159   : > { %p2429_p8 = por %p2428_p7, %p2427_p11 }
 0x15b   : > { %p2430_p12 = pnand %p2429_p8, %p2423_p5 }
 0x221   : > { %v1775_v16 = vpop.f32.mrb[0].mxu0  ;;  %v1781_v17 = vpop.f32.mrb[0].mxu1 }
 0x222   : > { %v639_v18 = vadd.f32 %v1775_v16, %v1670_v15  ;;  %v633_v19 = vpop.f32.mrb[1].mxu0  ;;  %v653_v20 = vpop.f32.mrb[1].mxu1  ;;  %v3009_v21 = vadd.f32 %v1781_v17, %v1670_v15  ;;  %v925_v16 = vld [vmem:[#allocation13] sm:$0xff]  ;;  %v926_v17 = vld [vmem:[#allocation13 + $0x8] sm:$0xff] }
 0x223   : > { %v634_v22 = vadd.f32 %v1670_v15, %v633_v19  ;;  %v654_v23 = vadd.f32 %v1670_v15, %v653_v20  ;;  %v2524_v19 = vmov 4   ;;  %v927_v20 = vld [vmem:[#allocation13 + $0x10] sm:$0xff] }
 0x224   : > { %v1681_v24 = vmul.f32 -1.442695, %v639_v18  ;;  %v1685_v32 = vmul.f32 -1.442695, %v3009_v21  ;;  %2016 = vset.pattern.permute.xlu1 %v2524_v19  ;;  %2019 = vset.pattern.permute.xlu0 %v2524_v19 }
 0x225   : > { %v1680_v25 = vmul.f32 -1.442695, %v634_v22  ;;  %v1684_v26 = vmul.f32 -1.442695, %v654_v23  ;;  %v1778_v27 = vpop.f32.mrb[2].mxu0  ;;  %v1784_v28 = vpop.f32.mrb[2].mxu1  ;;  %1154 = vperm.xlu1 %2016, %v2970_v1   ;;  %1166 = vperm.xlu0 %2019, %v3000_v7  }
 0x226   : > { %2040 = vpow2.f32 %v1681_v24  ;;  %v649_v29 = vadd.f32 %v1778_v27, %v1670_v15  ;;  %v643_v30 = vpop.f32.mrb[3].mxu0  ;;  %v663_v31 = vpop.f32.mrb[3].mxu1  ;;  %v669_v33 = vadd.f32 %v1784_v28, %v1670_v15  ;;  %v2526_v24 = vmov 5  }
 0x227   : > { %v644_v34 = vadd.f32 %v1670_v15, %v643_v30  ;;  %v664_v35 = vadd.f32 %v1670_v15, %v663_v31  ;;  %2042 = vpow2.f32 %v1680_v25  ;;  %v2527_v25 = vmov 6  }
 0x228   : > { %v1683_v36 = vmul.f32 -1.442695, %v649_v29  ;;  %2044 = vpow2.f32 %v1684_v26  ;;  %v1687_v39 = vmul.f32 -1.442695, %v669_v33 }
 0x229   : > { %v1682_v37 = vmul.f32 -1.442695, %v644_v34  ;;  %v1686_v38 = vmul.f32 -1.442695, %v664_v35  ;;  %1158 = vperm.xlu1 %2016, %v2976_v3   ;;  %1174 = vperm.xlu0 %2019, %v2979_v4  }
 0x22a   : > { %2046 = vpow2.f32 %v1683_v36 }
 0x22b   : > { %2048 = vpow2.f32 %v1685_v32 }
 0x22c   : > { %2050 = vpow2.f32 %v1682_v37 }
 0x22d   : > { %2052 = vpow2.f32 %v1686_v38  ;;  %1162 = vperm.xlu1 %2016, %v2982_v5  }
 0x22e   : > { %2054 = vpow2.f32 %v1687_v39 }
 0x230   : > { %v2041_v40 = vpop.eup %2040 }
 0x231   : > { %v697_v41 = vadd.f32 1.0, %v2041_v40  ;;  %v2043_v42 = vpop.eup %2042  ;;  %2017 = vset.pattern.permute.xlu1 %v2526_v24 }
 0x232   : > { %v2045_v43 = vpop.eup %2044  ;;  %v696_v44 = vadd.f32 1.0, %v2043_v42  ;;  %1190 = vperm.xlu1 %2017, %v2976_v3  }
 0x233   : > { %2056 = vrcp.f32 %v697_v41  ;;  %v700_v46 = vadd.f32 1.0, %v2045_v43 }
 0x234   : > { %v2047_v45 = vpop.eup %2046  ;;  %2058 = vrcp.f32 %v696_v44 }
 0x235   : > { %v2049_v47 = vpop.eup %2048  ;;  %v699_v48 = vadd.f32 1.0, %v2047_v45  ;;  %2060 = vrcp.f32 %v700_v46 }
 0x236   : > { %v2051_v49 = vpop.eup %2050  ;;  %v701_v52 = vadd.f32 1.0, %v2049_v47 }
 0x237   : > { %v2053_v50 = vpop.eup %2052  ;;  %v698_v51 = vadd.f32 1.0, %v2051_v49  ;;  %2062 = vrcp.f32 %v699_v48 }
 0x238   : > { %v2055_v53 = vpop.eup %2054  ;;  %v702_v54 = vadd.f32 1.0, %v2053_v50 }
 0x239   : > { %2064 = vrcp.f32 %v698_v51  ;;  %v703_v55 = vadd.f32 1.0, %v2055_v53 }
 0x23a   : > { %2066 = vrcp.f32 %v701_v52 }
 0x23b   : > { %2068 = vrcp.f32 %v702_v54 }
 0x23c   : > { %2070 = vrcp.f32 %v703_v55 }
 0x23d   : > { %v2057_v56 = vpop.eup %2056 }
 0x23e   : > { %v2059_v57 = vpop.eup %2058  ;;  %v721_v60 = vmul.f32 %v2057_v56, %v639_v18  ;;  %v1852_v18 = vpack.c.bf16 %v926_v17, %v925_v16 }
 0x23f   : > { %v720_v58 = vmul.f32 %v2059_v57, %v634_v22  ;;  %v2061_v59 = vpop.eup %2060 }
 0x240   : > { %v724_v10 = vmul.f32 %v2061_v59, %v654_v23  ;;  %1853 = vmatprep.subr.bf16.mxu0 %v1852_v18  ;;  %v2525_v23 = vmov 3  }
 0x241   : > { %v2063_v61 = vpop.eup %2062  ;;  %1793 = vmatprep.mubr.msk.f32.mxu1 %vm739_vm2, %v720_v58  ;;  %1855 = vmatpush3.bf16.msra.mxu0 %v1852_v18 }
 0x242   : > { %1794 = vmatmul.mubr.msk.f32.vlgmr.msra.gmra.mrb[4].mxu1 %vm739_vm2, %v721_v60  ;;  %v723_v0 = vmul.f32 %v2063_v61, %v649_v29  ;;  %2026 = vset.pattern.permute.xlu0 %v2525_v23 }
 0x243   : > { %v2065_v62 = vpop.eup %2064  ;;  %1122 = vperm.xlu0 %2026, %v2970_v1   ;;  %2018 = vset.pattern.permute.xlu1 %v2525_v23 }
 0x244   : > { %v722_v63 = vmul.f32 %v2065_v62, %v644_v34  ;;  %v2067_v9 = vpop.eup %2066  ;;  %1134 = vperm.xlu1 %2018, %v3000_v7  }
 0x245   : > { %v2069_v11 = vpop.eup %2068  ;;  %v725_v12 = vmul.f32 %v2067_v9, %v3009_v21  ;;  %v928_v21 = vld [vmem:[#allocation13 + $0x18] sm:$0xff] }
 0x246   : > { %1796 = vmatprep.mubr.msk.f32.mxu1 %vm739_vm2, %v722_v63  ;;  %v2071_v13 = vpop.eup %2070  ;;  %v726_v14 = vmul.f32 %v2069_v11, %v664_v35  ;;  %v1856_v22 = vpack.c.bf16 %v928_v21, %v927_v20  ;;  %v1341_v20 = vld [vmem:[#allocation16 + $0x8] sm:$0xff] }
 0x247   : > { %1797 = vmatmul.mubr.msk.f32.gmra.mrb[6].mxu1 %vm739_vm2, %v723_v0  ;;  %v727_v15 = vmul.f32 %v2071_v13, %v669_v33  ;;  %1126 = vperm.xlu0 %2026, %v2976_v3  }
 0x248   : > { %1799 = vmatprep.mubr.msk.f32.mxu1 %vm739_vm2, %v724_v10  ;;  %1857 = vmatprep.subr.bf16.mxu0 %v1856_v22 }
 0x249   : > { %1859 = vmatpush3.bf16.msra.mxu0 %v1856_v22  ;;  %2020 = vset.pattern.permute.xlu1 %v2526_v24  ;;  %v2528_v22 = vmov 0.0|0.0  }
 0x24a   : > { %1194 = vperm.xlu1 %2020, %v2982_v5   ;;  %1860 = vmatprep.subr.bf16.mxu1 %v2528_v22 }
 0x24b   : > { %1800 = vmatmul.mubr.msk.f32.gmra.mrb[8].mxu1 %vm739_vm2, %v725_v12  ;;  %1130 = vperm.xlu0 %2026, %v2982_v5  }
 0x24c   : > { %1802 = vmatprep.mubr.msk.f32.mxu1 %vm739_vm2, %v726_v14 }
 0x24e   : > { %2021 = vset.pattern.permute.xlu1 %v2527_v25 }
 0x24f   : > { %1803 = vmatmul.mubr.msk.f32.gmra.mrb[10].mxu1 %vm739_vm2, %v727_v15  ;;  %1146 = vperm.xlu0 %2026, %v2985_v6  }
 0x250   : > { %1218 = vperm.xlu1 %2021, %v2970_v1  }
 0x253   : > { %2029 = vset.pattern.permute.xlu0 %v2526_v24 }
 0x254   : > { %1186 = vperm.xlu0 %2029, %v2970_v1   ;;  %2022 = vset.pattern.permute.xlu1 %v2525_v23  ;;  %v1688_v1 = vld [vmem:[#allocation11] ss:$0 sm:$0xff] }
 0x255   : > { %1138 = vperm.xlu1 %2022, %v2973_v2  }
 0x258   : > { %1198 = vperm.xlu0 %2029, %v3000_v7  }
 0x259   : > { %2023 = vset.pattern.permute.xlu1 %v2524_v19 }
 0x25a   : > { %1170 = vperm.xlu1 %2023, %v2973_v2  }
 0x25c   : > { %1210 = vperm.xlu0 %2029, %v2985_v6  }
 0x25e   : > { %2024 = vset.pattern.permute.xlu1 %v2527_v25 }
 0x25f   : > { %1226 = vperm.xlu1 %2024, %v2982_v5  }
 0x260   : > { %2034 = vset.pattern.permute.xlu0 %v2527_v25 }
 0x261   : > { %1222 = vperm.xlu0 %2034, %v2976_v3  }
 0x263   : > { %2025 = vset.pattern.permute.xlu1 %v2525_v23 }
 0x264   : > { %1142 = vperm.xlu1 %2025, %v2979_v4  }
 0x265   : > { %1234 = vperm.xlu0 %2034, %v2973_v2  }
 0x268   : > { %2027 = vset.pattern.permute.xlu1 %v2526_v24 }
 0x269   : > { %1242 = vperm.xlu0 %2034, %v2985_v6   ;;  %1202 = vperm.xlu1 %2027, %v2973_v2  }
 0x26d   : > { %2028 = vset.pattern.permute.xlu1 %v2527_v25 }
 0x26e   : > { %1230 = vperm.xlu1 %2028, %v3000_v7  }
 0x272   : > { %2030 = vset.pattern.permute.xlu1 %v2524_v19 }
 0x273   : > { %1178 = vperm.xlu1 %2030, %v2985_v6  }
 0x277   : > { %2031 = vset.pattern.permute.xlu1 %v2526_v24 }
 0x278   : > { %1206 = vperm.xlu1 %2031, %v2979_v4  }
 0x27c   : > { %2032 = vset.pattern.permute.xlu1 %v2525_v23  ;;  %v1342_v23 = vld [vmem:[#allocation16 + $0x10] sm:$0xff] }
 0x27d   : > { %1150 = vperm.xlu1 %2032, %v3003_v8  }
 0x281   : > { %2033 = vset.pattern.permute.xlu1 %v2524_v19  ;;  %v1340_v19 = vld [vmem:[#allocation16] sm:$0xff] }
 0x282   : > { %1182 = vperm.xlu1 %2033, %v3003_v8   ;;  %v1861_v21 = vpack.c.bf16 %v1341_v20, %v1340_v19 }
 0x284   : > { %1862 = vmatpush3.bf16.msra.mxu1 %v1861_v21 }
 0x285   : > { %1863 = vmatprep.subr.bf16.mxu1 %v2528_v22 }
 0x286   : > { %2035 = vset.pattern.permute.xlu1 %v2527_v25 }
 0x287   : > { %1238 = vperm.xlu1 %2035, %v2979_v4  }
 0x28b   : > { %2036 = vset.pattern.permute.xlu1 %v2526_v24  ;;  %v1343_v24 = vld [vmem:[#allocation16 + $0x18] sm:$0xff] }
 0x28c   : > { %1214 = vperm.xlu1 %2036, %v3003_v8  }
 0x290   : > { %2037 = vset.pattern.permute.xlu1 %v2527_v25  ;;  %v1864_v25 = vpack.c.bf16 %v1343_v24, %v1342_v23 }
 0x291   : > { %1246 = vperm.xlu1 %2037, %v3003_v8  }
 0x292   : > { %1865 = vmatpush3.bf16.msra.mxu1 %v1864_v25 }
 0x293   : > { %1866 = vmatprep.subr.bf16.mxu1 %v2528_v22 }
 0x315   : > { %v1795_v2 = vpop.f32.mrb[4].mxu1 }
 0x316   : > { %v836_v3 = vadd.f32 %v1795_v2, %v1688_v1  ;;  %v830_v5 = vpop.f32.mrb[5].mxu1  ;;  %v1345_v2 = vld [vmem:[#allocation16 + $0x28] sm:$0xff] }
 0x317   : > { %v831_v6 = vadd.f32 %v1688_v1, %v830_v5  ;;  %v3061_v5 = vpop.permute.xlu1 %1154 }
 0x318   : > { %v1698_v7 = vmul.f32 -1.442695, %v836_v3 }
 0x319   : > { %v1697_v26 = vmul.f32 -1.442695, %v831_v6 }
 0x31a   : > { %v1798_v27 = vpop.f32.mrb[6].mxu1  ;;  %2072 = vpow2.f32 %v1698_v7  ;;  %v1347_v7 = vld [vmem:[#allocation16 + $0x38] sm:$0xff] }
 0x31b   : > { %v846_v28 = vadd.f32 %v1798_v27, %v1688_v1  ;;  %v840_v29 = vpop.f32.mrb[7].mxu1  ;;  %2074 = vpow2.f32 %v1697_v26  ;;  %v2530_v27 = vmov 0.0  }
 0x31c   : > { %v841_v30 = vadd.f32 %v1688_v1, %v840_v29  ;;  %1841 = vmatprep.mubr.msk.f32.mxu1 %vm2529_vm3, %v2530_v27  ;;  %v1449_v29 = vld [vmem:[%s2943_s24] sm:$0xff] }
 0x31d   : > { %v1700_v4 = vmul.f32 -1.442695, %v846_v28  ;;  %vm1450_vm4 = vcmp.gt.f32.partialorder %v1449_v29, 0.0 }
 0x31e   : > { %v1699_v31 = vmul.f32 -1.442695, %v841_v30  ;;  %v1801_v32 = vpop.f32.mrb[8].mxu1 }
 0x31f   : > { %2076 = vpow2.f32 %v1700_v4  ;;  %v856_v33 = vadd.f32 %v1801_v32, %v1688_v1  ;;  %v850_v34 = vpop.f32.mrb[9].mxu1 }
 0x320   : > { %2078 = vpow2.f32 %v1699_v31  ;;  %v851_v8 = vadd.f32 %v1688_v1, %v850_v34 }
 0x321   : > { %v1702_v35 = vmul.f32 -1.442695, %v856_v33 }
 0x322   : > { %v1701_v36 = vmul.f32 -1.442695, %v851_v8  ;;  %v1804_v37 = vpop.f32.mrb[10].mxu1 }
 0x323   : > { %2080 = vpow2.f32 %v1702_v35  ;;  %v866_v38 = vadd.f32 %v1804_v37, %v1688_v1  ;;  %v860_v39 = vpop.f32.mrb[11].mxu1 }
 0x324   : > { %2082 = vpow2.f32 %v1701_v36  ;;  %v861_v40 = vadd.f32 %v1688_v1, %v860_v39  ;;  %v2073_v41 = vpop.eup %2072  ;;  %v1344_v1 = vld [vmem:[#allocation16 + $0x20] sm:$0xff]  ;;  %v3078_v36 = vpop.permute.xlu0 %1166 }
 0x325   : > { %v1704_v42 = vmul.f32 -1.442695, %v866_v38  ;;  %v2075_v43 = vpop.eup %2074  ;;  %v894_v44 = vadd.f32 1.0, %v2073_v41 }
 0x326   : > { %v1703_v45 = vmul.f32 -1.442695, %v861_v40  ;;  %v893_v46 = vadd.f32 1.0, %v2075_v43 }
 0x327   : > { %2084 = vpow2.f32 %v1704_v42 }
 0x328   : > { %2086 = vrcp.f32 %v894_v44 }
 0x329   : > { %v2077_v47 = vpop.eup %2076  ;;  %2088 = vrcp.f32 %v893_v46 }
 0x32a   : > { %v2079_v48 = vpop.eup %2078  ;;  %v896_v49 = vadd.f32 1.0, %v2077_v47  ;;  %2090 = vpow2.f32 %v1703_v45  ;;  %v1705_v45 = vld [vmem:[#allocation14] ss:$0 sm:$0xff] }
 0x32b   : > { %v895_v50 = vadd.f32 1.0, %v2079_v48 }
 0x32c   : > { %2092 = vrcp.f32 %v896_v49 }
 0x32d   : > { %v2081_v51 = vpop.eup %2080  ;;  %2094 = vrcp.f32 %v895_v50 }
 0x32e   : > { %v2083_v52 = vpop.eup %2082  ;;  %v898_v53 = vadd.f32 1.0, %v2081_v51 }
 0x32f   : > { %v897_v54 = vadd.f32 1.0, %v2083_v52 }
 0x330   : > { %2096 = vrcp.f32 %v898_v53 }
 0x331   : > { %v2085_v55 = vpop.eup %2084  ;;  %2098 = vrcp.f32 %v897_v54 }
 0x332   : > { %v2087_v56 = vpop.eup %2086  ;;  %v900_v57 = vadd.f32 1.0, %v2085_v55 }
 0x333   : > { %v2089_v58 = vpop.eup %2088  ;;  %v918_v61 = vmul.f32 %v2087_v56, %v836_v3  ;;  %v1867_v3 = vpack.c.bf16 %v1345_v2, %v1344_v1 }
 0x334   : > { %v2091_v59 = vpop.eup %2090  ;;  %v917_v60 = vmul.f32 %v2089_v58, %v831_v6  ;;  %2100 = vrcp.f32 %v900_v57  ;;  %v1346_v6 = vld [vmem:[#allocation16 + $0x30] sm:$0xff] }
 0x335   : > { %v899_v62 = vadd.f32 1.0, %v2091_v59  ;;  %1868 = vmatpush3.bf16.msra.mxu1 %v1867_v3  ;;  %v1870_v26 = vpack.c.bf16 %v1347_v7, %v1346_v6 }
 0x336   : > { %v2093_v63 = vpop.eup %2092  ;;  %1813 = vmatprep.mubr.msk.f32.mxu0 %vm739_vm2, %v917_v60  ;;  %1869 = vmatprep.subr.bf16.mxu1 %v2528_v22 }
 0x337   : > { %v2095_v0 = vpop.eup %2094  ;;  %2102 = vrcp.f32 %v899_v62  ;;  %1814 = vmatmul.mubr.msk.f32.vlgmr.msra.gmra.mrb[4].mxu0 %vm739_vm2, %v918_v61  ;;  %v920_v10 = vmul.f32 %v2093_v63, %v846_v28  ;;  %v3063_v28 = vpop.permute.xlu1 %1158 }
 0x338   : > { %v919_v9 = vmul.f32 %v2095_v0, %v841_v30  ;;  %v2531_v30 = vmov 0  }
 0x339   : > { %1871 = vmatpush3.bf16.msra.mxu1 %v1870_v26  ;;  %2038 = vset.pattern.permute.xlu1 %v2531_v30  ;;  %v1451_v4 = vsel %vm1450_vm4, 1, %v2531_v30 }
 0x33a   : > { %v2097_v11 = vpop.eup %2096  ;;  %1816 = vmatprep.mubr.msk.f32.mxu0 %vm739_vm2, %v919_v9  ;;  %2039 = vset.pattern.permute.xlu0 %v2531_v30 }
 0x33b   : > { %v2099_v12 = vpop.eup %2098  ;;  %1817 = vmatmul.mubr.msk.f32.gmra.mrb[6].mxu0 %vm739_vm2, %v920_v10  ;;  %v922_v14 = vmul.f32 %v2097_v11, %v856_v33  ;;  %1453 = vperm.xlu1 %2038, %v1451_v4   ;;  %v3066_v31 = vpop.permute.xlu1 %1162 }
 0x33c   : > { %v921_v13 = vmul.f32 %v2099_v12, %v851_v8 }
 0x33e   : > { %1819 = vmatprep.mubr.msk.f32.mxu0 %vm739_vm2, %v921_v13  ;;  %v2101_v15 = vpop.eup %2100 }
 0x33f   : > { %1820 = vmatmul.mubr.msk.f32.gmra.mrb[8].mxu0 %vm739_vm2, %v922_v14  ;;  %v924_v18 = vmul.f32 %v2101_v15, %v866_v38  ;;  %v3068_v32 = vpop.permute.xlu1 %1190  ;;  %v3082_v38 = vpop.permute.xlu0 %1174 }
 0x341   : > { %v2103_v16 = vpop.eup %2102 }
 0x342   : > { %v923_v17 = vmul.f32 %v2103_v16, %v861_v40 }
 0x343   : > { %v3070_v33 = vpop.permute.xlu1 %1134  ;;  %v3086_v40 = vpop.permute.xlu0 %1122 }
 0x344   : > { %1822 = vmatprep.mubr.msk.f32.mxu0 %vm739_vm2, %v923_v17  ;;  %v1250_v4 = vsel %vm1249_vm5, %v3086_v40, %v3061_v5 }
 0x345   : > { %1823 = vmatmul.mubr.msk.f32.gmra.mrb[10].mxu0 %vm739_vm2, %v924_v18 }
 0x347   : > { %v3072_v34 = vpop.permute.xlu1 %1194  ;;  %v1127_v42 = vpop.permute.xlu0 %1126 }
 0x348   : > { %v1251_v29 = vsel %vm1249_vm5, %v1127_v42, %v3063_v28 }
 0x34b   : > { %v3074_v8 = vpop.permute.xlu1 %1218  ;;  %v3092_v44 = vpop.permute.xlu0 %1130 }
 0x34f   : > { %v3076_v35 = vpop.permute.xlu1 %1138  ;;  %v3100_v51 = vpop.permute.xlu0 %1146 }
 0x353   : > { %v3080_v37 = vpop.permute.xlu1 %1170  ;;  %v1187_v62 = vpop.permute.xlu0 %1186 }
 0x357   : > { %v3084_v39 = vpop.permute.xlu1 %1226  ;;  %v1199_v15 = vpop.permute.xlu0 %1198 }
 0x35b   : > { %v3088_v41 = vpop.permute.xlu1 %1142  ;;  %v3126_v3 = vpop.permute.xlu0 %1210 }
 0x35f   : > { %v3090_v43 = vpop.permute.xlu1 %1202  ;;  %v1223_v28 = vpop.permute.xlu0 %1222 }
 0x363   : > { %v3094_v46 = vpop.permute.xlu1 %1230 }
 0x367   : > { %v3103_v53 = vpop.permute.xlu1 %1178 }
 0x36b   : > { %v3114_v9 = vpop.permute.xlu1 %1206 }
 0x36f   : > { %v1151_v19 = vpop.permute.xlu1 %1150 }
 0x373   : > { %v1183_v7 = vpop.permute.xlu1 %1182 }
 0x377   : > { %v1239_v5 = vpop.permute.xlu1 %1238 }
 0x40a   : > { %v1815_v47 = vpop.f32.mrb[4].mxu0 }
 0x40b   : > { %v3096_v48 = vadd.f32 %v1815_v47, %v1705_v45  ;;  %v1026_v49 = vpop.f32.mrb[5].mxu0  ;;  %v1253_v47 = vsel %vm1249_vm5, %v3070_v33, %v3078_v36  ;;  %v1255_v33 = vsel %vm1249_vm5, %v3088_v41, %v3082_v38 }
 0x40c   : > { %v3098_v50 = vadd.f32 %v1705_v45, %v1026_v49  ;;  %v1259_v49 = vsel %vm739_vm2, %v1251_v29, %v3068_v32 }
 0x40d   : > { %v1715_v52 = vmul.f32 -1.442695, %v3096_v48 }
 0x40e   : > { %v1714_v54 = vmul.f32 -1.442695, %v3098_v50  ;;  %v1818_v55 = vpop.f32.mrb[6].mxu0 }
 0x40f   : > { %2104 = vpow2.f32 %v1715_v52  ;;  %v3106_v56 = vadd.f32 %v1818_v55, %v1705_v45  ;;  %v1036_v57 = vpop.f32.mrb[7].mxu0  ;;  %v1252_v52 = vsel %vm1249_vm5, %v3092_v44, %v3066_v31  ;;  %v1261_v55 = vsel %vm739_vm2, %v1253_v47, %v1199_v15 }
 0x410   : > { %2106 = vpow2.f32 %v1714_v54  ;;  %v3108_v58 = vadd.f32 %v1705_v45, %v1036_v57  ;;  %v1258_v54 = vsel %vm739_vm2, %v1250_v4, %v1187_v62  ;;  %v1260_v31 = vsel %vm739_vm2, %v1252_v52, %v3072_v34 }
 0x411   : > { %v1717_v59 = vmul.f32 -1.442695, %v3106_v56  ;;  %v1268_v44 = vsel %vm1266_vm6, %v1259_v49, %v1223_v28  ;;  %v1270_v62 = vsel %vm1266_vm6, %v1261_v55, %v3094_v46  ;;  %v1263_v34 = vsel %vm739_vm2, %v1255_v33, %v3114_v9 }
 0x412   : > { %v1716_v60 = vmul.f32 -1.442695, %v3108_v58  ;;  %v1821_v61 = vpop.f32.mrb[8].mxu0  ;;  %v1269_v46 = vsel %vm1266_vm6, %v1260_v31, %v3084_v39 }
 0x413   : > { %2108 = vpow2.f32 %v1717_v59  ;;  %v3112_v63 = vadd.f32 %v1821_v61, %v1705_v45  ;;  %v1046_v0 = vpop.f32.mrb[9].mxu0  ;;  %v1254_v61 = vsel %vm1249_vm5, %v3076_v35, %v3080_v37 }
 0x414   : > { %2110 = vpow2.f32 %v1716_v60  ;;  %v3116_v10 = vadd.f32 %v1705_v45, %v1046_v0  ;;  %v1267_v60 = vsel %vm1266_vm6, %v1258_v54, %v3074_v8  ;;  %v1262_v9 = vsel %vm739_vm2, %v1254_v61, %v3090_v43 }
 0x415   : > { %v1719_v11 = vmul.f32 -1.442695, %v3112_v63 }
 0x416   : > { %v1718_v12 = vmul.f32 -1.442695, %v3116_v10 }
 0x417   : > { %2112 = vpow2.f32 %v1719_v11 }
 0x418   : > { %2114 = vpow2.f32 %v1718_v12  ;;  %v1824_v13 = vpop.f32.mrb[10].mxu0 }
 0x419   : > { %v2105_v14 = vpop.eup %2104  ;;  %v3120_v16 = vadd.f32 %v1824_v13, %v1705_v45  ;;  %v1056_v17 = vpop.f32.mrb[11].mxu0  ;;  %v1257_v13 = vsel %vm1249_vm5, %v1151_v19, %v1183_v7 }
 0x41a   : > { %v2107_v18 = vpop.eup %2106  ;;  %v1090_v20 = vadd.f32 1.0, %v2105_v14  ;;  %v3122_v21 = vadd.f32 %v1705_v45, %v1056_v17 }
 0x41b   : > { %v1089_v22 = vadd.f32 1.0, %v2107_v18  ;;  %v1721_v23 = vmul.f32 -1.442695, %v3120_v16 }
 0x41c   : > { %2116 = vrcp.f32 %v1090_v20  ;;  %v1720_v24 = vmul.f32 -1.442695, %v3122_v21  ;;  %v1235_v20 = vpop.permute.xlu0 %1234 }
 0x41d   : > { %v2109_v25 = vpop.eup %2108  ;;  %2118 = vrcp.f32 %v1089_v22  ;;  %v1272_v22 = vsel %vm1266_vm6, %v1263_v34, %v1239_v5 }
 0x41e   : > { %v2111_v1 = vpop.eup %2110  ;;  %v1092_v2 = vadd.f32 1.0, %v2109_v25  ;;  %2120 = vpow2.f32 %v1721_v23 }
 0x41f   : > { %v1091_v6 = vadd.f32 1.0, %v2111_v1  ;;  %2122 = vpow2.f32 %v1720_v24 }
 0x420   : > { %2124 = vrcp.f32 %v1092_v2 }
 0x421   : > { %v2113_v26 = vpop.eup %2112  ;;  %2126 = vrcp.f32 %v1091_v6 }
 0x422   : > { %v2115_v27 = vpop.eup %2114  ;;  %v1094_v30 = vadd.f32 1.0, %v2113_v26 }
 0x423   : > { %v1093_v45 = vadd.f32 1.0, %v2115_v27 }
 0x424   : > { %2128 = vrcp.f32 %v1094_v30 }
 0x425   : > { %2130 = vrcp.f32 %v1093_v45 }
 0x426   : > { %v2117_v42 = vpop.eup %2116 }
 0x427   : > { %v2119_v40 = vpop.eup %2118  ;;  %v1114_v32 = vmul.f32 %v2117_v42, %v3096_v48 }
 0x428   : > { %v2121_v36 = vpop.eup %2120  ;;  %v1113_v57 = vmul.f32 %v2119_v40, %v3098_v50  ;;  %v1215_v50 = vpop.permute.xlu1 %1214 }
 0x429   : > { %v2123_v59 = vpop.eup %2122  ;;  %v1276_v38 = vmul.f32 %v1268_v44, %v1114_v32  ;;  %v1096_v41 = vadd.f32 1.0, %v2121_v36  ;;  %v1265_v43 = vsel %vm739_vm2, %v1257_v13, %v1215_v50  ;;  %v1243_v36 = vpop.permute.xlu0 %1242 }
 0x42a   : > { %v2125_v48 = vpop.eup %2124  ;;  %v1275_v0 = vmul.f32 %v1267_v60, %v1113_v57  ;;  %v1095_v11 = vadd.f32 1.0, %v2123_v59 }
 0x42b   : > { %v2127_v12 = vpop.eup %2126  ;;  %v1291_v8 = vsel %vm1283_vm7, %v1276_v38, 0.0  ;;  %v1116_v14 = vmul.f32 %v2125_v48, %v3106_v56  ;;  %2132 = vrcp.f32 %v1096_v41  ;;  %v1256_v56 = vsel %vm1249_vm5, %v3100_v51, %v3103_v53 }
 0x42c   : > { %v1292_v35 = vrot.slane %v1291_v8, 4  ;;  %v1284_v37 = vsel %vm1283_vm7, %v1275_v0, 0.0  ;;  %v1115_v15 = vmul.f32 %v2127_v12, %v3108_v58  ;;  %2134 = vrcp.f32 %v1095_v11  ;;  %v1247_v51 = vpop.permute.xlu1 %1246 }
 0x42d   : > { %v1285_v17 = vrot.slane %v1284_v37, 4  ;;  %v1278_v18 = vmul.f32 %v1270_v62, %v1116_v14  ;;  %v1271_v53 = vsel %vm1266_vm6, %v1262_v9, %v1235_v20  ;;  %v1264_v47 = vsel %vm739_vm2, %v1256_v56, %v3126_v3 }
 0x42e   : > { %v2129_v19 = vpop.eup %2128  ;;  %v1293_v23 = vadd.f32 %v1292_v35, %v1291_v8  ;;  %v1277_v24 = vmul.f32 %v1269_v46, %v1115_v15  ;;  %v1274_v42 = vsel %vm1266_vm6, %v1265_v43, %v1247_v51  ;;  %v1273_v34 = vsel %vm1266_vm6, %v1264_v47, %v1243_v36 }
 0x42f   : > { %v2131_v58 = vpop.eup %2130  ;;  %v1286_v25 = vadd.f32 %v1285_v17, %v1284_v37  ;;  %v1305_v1 = vsel %vm1283_vm7, %v1278_v18, 0.0  ;;  %v1118_v39 = vmul.f32 %v2129_v19, %v3112_v63 }
 0x430   : > { %v1294_v2 = vrot.slane %v1293_v23, 2  ;;  %v1306_v6 = vrot.slane %v1305_v1, 4  ;;  %v1298_v7 = vsel %vm1283_vm7, %v1277_v24, 0.0  ;;  %v1117_v26 = vmul.f32 %v2131_v58, %v3116_v10 }
 0x431   : > { %v1287_v27 = vrot.slane %v1286_v25, 2  ;;  %v1299_v29 = vrot.slane %v1298_v7, 4  ;;  %v1280_v30 = vmul.f32 %v1272_v22, %v1118_v39 }
 0x432   : > { %v1295_v4 = vadd.f32 %v1294_v2, %v1293_v23  ;;  %v1307_v45 = vadd.f32 %v1306_v6, %v1305_v1  ;;  %v1279_v63 = vmul.f32 %v1271_v53, %v1117_v26 }
 0x433   : > { %v1288_v49 = vadd.f32 %v1287_v27, %v1286_v25  ;;  %v1300_v52 = vadd.f32 %v1299_v29, %v1298_v7  ;;  %v1319_v28 = vsel %vm1283_vm7, %v1280_v30, 0.0  ;;  %v1454_v29 = vpop.permute.xlu1 %1453  ;;  %v1722_v30 = vld [vmem:[#allocation17] ss:$0 sm:$0xff] }
 0x434   : > { %v1296_v54 = vrot.slane %v1295_v4, 1  ;;  %v1308_v10 = vrot.slane %v1307_v45, 2  ;;  %v1320_v5 = vrot.slane %v1319_v28, 4  ;;  %v1312_v40 = vsel %vm1283_vm7, %v1279_v63, 0.0 }
 0x435   : > { %v2133_v55 = vpop.eup %2132  ;;  %v1289_v33 = vrot.slane %v1288_v49, 1  ;;  %v1301_v32 = vrot.slane %v1300_v52, 2  ;;  %v1313_v31 = vrot.slane %v1312_v40, 4  ;;  %vm1455_vm15 = vcmp.eq.s32.totalorder %v1454_v29, 1 }
 0x436   : > { %v2135_v44 = vpop.eup %2134  ;;  %v1297_v3 = vadd.f32 %v1296_v54, %v1295_v4  ;;  %v1309_v57 = vadd.f32 %v1308_v10, %v1307_v45  ;;  %v1321_v59 = vadd.f32 %v1320_v5, %v1319_v28  ;;  %v1120_v60 = vmul.f32 %v2133_v55, %v3120_v16 }
 0x437   : > { %v1290_v61 = vadd.f32 %v1289_v33, %v1288_v49  ;;  %v1302_v38 = vadd.f32 %v1301_v32, %v1300_v52  ;;  %v1314_v41 = vadd.f32 %v1313_v31, %v1312_v40  ;;  %v1119_v48 = vmul.f32 %v2135_v44, %v3122_v21 }
 0x438   : > { %v1310_v62 = vrot.slane %v1309_v57, 1  ;;  %v1322_v0 = vrot.slane %v1321_v59, 2  ;;  %v1282_v11 = vmul.f32 %v1274_v42, %v1120_v60 }
 0x439   : > { %v1364_v50 = vsel %vm1363_vm8, %v1297_v3, %v1290_v61  ;;  %v1303_v12 = vrot.slane %v1302_v38, 1  ;;  %v1315_v13 = vrot.slane %v1314_v41, 2  ;;  %v1281_v8 = vmul.f32 %v1273_v34, %v1119_v48 }
 0x43a   : > { %v1323_v14 = vadd.f32 %v1322_v0, %v1321_v59  ;;  %v1333_v35 = vsel %vm1283_vm7, %v1282_v11, 0.0  ;;  %v1311_v46 = vadd.f32 %v1310_v62, %v1309_v57 }
 0x43b   : > { %v1304_v16 = vadd.f32 %v1303_v12, %v1302_v38  ;;  %v1316_v37 = vadd.f32 %v1315_v13, %v1314_v41  ;;  %v1326_v15 = vsel %vm1283_vm7, %v1281_v8, 0.0  ;;  %v1334_v21 = vrot.slane %v1333_v35, 4 }
 0x43c   : > { %v1324_v9 = vrot.slane %v1323_v14, 1  ;;  %v1327_v17 = vrot.slane %v1326_v15, 4 }
 0x43d   : > { %v1366_v18 = vsel %vm1365_vm9, %v1304_v16, %v1364_v50  ;;  %v1317_v19 = vrot.slane %v1316_v37, 1  ;;  %v1335_v56 = vadd.f32 %v1334_v21, %v1333_v35 }
 0x43e   : > { %v1328_v20 = vadd.f32 %v1327_v17, %v1326_v15  ;;  %v1368_v22 = vsel %vm1367_vm10, %v1311_v46, %v1366_v18  ;;  %v1325_v58 = vadd.f32 %v1324_v9, %v1323_v14 }
 0x43f   : > { %v1318_v23 = vadd.f32 %v1317_v19, %v1316_v37  ;;  %v1336_v24 = vrot.slane %v1335_v56, 2 }
 0x440   : > { %v1329_v25 = vrot.slane %v1328_v20, 2 }
 0x441   : > { %v1337_v1 = vadd.f32 %v1336_v24, %v1335_v56  ;;  %v1370_v39 = vsel %vm1369_vm11, %v1318_v23, %v1368_v22 }
 0x442   : > { %v1330_v43 = vadd.f32 %v1329_v25, %v1328_v20  ;;  %v1372_v2 = vsel %vm1371_vm12, %v1325_v58, %v1370_v39 }
 0x443   : > { %v1338_v6 = vrot.slane %v1337_v1, 1 }
 0x444   : > { %v1331_v7 = vrot.slane %v1330_v43, 1 }
 0x445   : > { %v1339_v51 = vadd.f32 %v1338_v6, %v1337_v1 }
 0x446   : > { %v1332_v26 = vadd.f32 %v1331_v7, %v1330_v43 }
 0x448   : > { %v1374_v53 = vsel %vm1373_vm13, %v1332_v26, %v1372_v2 }
 0x449   : > { %v1376_v27 = vsel %vm1375_vm14, %v1339_v51, %v1374_v53 }
 0x44a   : > { %1842 = vmatmul.mubr.msk.f32.vlgmr.msra.gmra.mrb[12].mxu1 %vm1283_vm7, %v1376_v27 }
 0x51d   : > { %v1445_v4 = vpop.f32.mrb[12].mxu1 }
 0x51e   : > { %v1446_v45 = vadd.f32 %v1722_v30, %v1445_v4  ;;  %v1843_v47 = vpop.f32.mrb[13].mxu1 }
 0x520   : > { %v1456_v63 = vsel %vm1455_vm15, %v1446_v45, 0.0 }
 0x521   : > { %1458 = vst.msk [vmem:[%s520_s22] sm:$0xff] %vm1457_vm0, %v1456_v63 }
 0x522   : > { %2433 = shalt.err (!%p2430_p12)
}
 0x523   : > { %s2434_s7 = scalar_lea.hbm %s3197_s18, 128  ;;  %s2438_s10 = scalar_lea.hbm %s3297_s29, 512 }
 0x524   : > { %p2435_p13 = scmp.ne.s32.totalorder %s3197_s18, %s2434_s7  ;;  %p2439_p2 = scmp.lt.u32.totalorder %s3197_s18, %s3297_s29 }
 0x525   : > { %p2440_p9 = scmp.lt.u32.totalorder %s2438_s10, %s2434_s7  ;;  %p2442_p4 = scmp.lt.u32.totalorder %s2434_s7, %s3197_s18 }
 0x526   : > { %p2436_p1 = pnand %p2435_p13, %p3298_p6 }
 0x527   : > { %p2441_p10 = por %p2440_p9, %p2439_p2 }
 0x528   : > { %p2437_p3 = pneg %p2436_p1 }
 0x529   : > { %p2443_p0 = por %p2442_p4, %p2441_p10 }
 0x52b   : > { %p2444_p5 = pnand %p2443_p0, %p2437_p3 }
 0x52d   : > { %2447 = shalt.err (!%p2444_p5)
}
 0x52e   : > { %1910 = dma.vmem_to_hbm [thread:$0]  (%p3298_p6), %s3199_s28, 128, %s3197_s18, %s1460_s19  }
 0x52f PF: > { %p1965_p11 = scmp.ge.s32.totalorder %s2510_s16, 2  ;;  %s1485_s20 = sand.u32 1, %s2498_s13  }
 0x530   : > { %p3299_p7 = scmp.ne.s32.totalorder %s3279_s12, 0  ;;  %s1486_s24 = scalar_lea.sflag [#allocation4], %s1485_s20 }
 0x532   : > { %p1945_p8 = pnand %p1965_p11, %p3299_p7 }
 0x534   : > { %2493 = dma.done.wait (!%p1945_p8), %s1486_s24, 128  }
 0x535   : > { %2495 = vsyncadd (!%p1945_p8), %s1486_s24, 4294967168  ;;  %p30_p12 = scmp.ge.s32.totalorder %s2813_s25, 6   ;;  %s3300_s13 = smov %s2502_s14 }
 0x536   : > { %s3301_s14 = smov %s2506_s15  ;;  %s3302_s15 = smov %s2824_s3 }
 0x537   : > { %s3303_s16 = smov %s2813_s25  ;;  %32 = sbr.rel (!%p30_p12) target bundleno = 20 (0x14), region = 150 }
 0x53e   :  { %1491 = vsyncpa [#allocation3], 1 }
 0x53f   :  { %1493 = vsyncpa [#allocation3 + $0x1], 1 }
 0x540   :  { %1494 = vsyncpa [#allocation6], 1 }
 0x541   :  { %1496 = vsyncpa [#allocation6 + $0x1], 1 }
 0x542   :  { %1497 = vsyncpa [#allocation9], 1 }
 0x543   :  { %1498 = vsyncpa [#allocation12], 1 }
 0x544   :  { %1499 = vsyncpa [#allocation15], 1 }
 0x545   :  { %1500 = vsyncpa [#allocation18], 1 }
 0x546   :  { %1501 = vsyncpa [#allocation4], 1 }
 0x547   :  { %1503 = vsyncpa [#allocation4 + $0x1], 1 }

</bundles_post_ra>
